<compile_context>
chip_gen: v5e
topology: v5e:2x2
jax: 0.10.0
libtpu: 0.0.40
codegen_flags: <defaults>
</compile_context>

<pallas_src>
import functools

import jax
import jax.numpy as jnp
from jax.experimental import pallas as pl
from jax.experimental.pallas import tpu as pltpu

BN_EPS = 1e-5
C_LANE = 128          # lane width: pad channel axes to a multiple of this
TM_TARGET = 2048      # M-tile rows (sweepable 2048-8192; fits VMEM on all gens)


def _round_up(x, mult):
    return ((x + mult - 1) // mult) * mult


def _mlp_layer_kernel(x_ref, w_ref, gb_ref, o_ref,
                      sum_ref, sq_ref, scale_ref, shift_ref,
                      *, inv_m, tm, m_true, mask_rows):
    """One fused layer: 1x1 conv + training-mode BatchNorm2d + ReLU.

    Grid = (2, num_m_tiles): pass 0 accumulates global per-channel stats,
    pass 1 recomputes the conv and applies the folded scale/shift + ReLU.

    x_ref:  (tm, Cp)  input rows (channels lane-padded)
    w_ref:  (Cp, Cp)  conv weight, transposed + zero-padded
    gb_ref: (2,  Cp)  row 0 = gamma, row 1 = beta (zero on padded channels)
    o_ref:  (tm, Cp)  output rows
    """
    pass_idx = pl.program_id(0)
    tile_idx = pl.program_id(1)
    num_tiles = pl.num_programs(1)

    # 1x1 conv == channels-last matmul.  Recomputed in pass 1: cheaper than an
    # extra HBM round-trip of the pre-BN activation (same bytes as re-reading x).
    y = jnp.dot(x_ref[...], w_ref[...], preferred_element_type=jnp.float32)

    # ---- pass 0: accumulate per-channel sum / sum-of-squares over all tiles ----
    @pl.when((pass_idx == 0) & (tile_idx == 0))
    def _():
        sum_ref[...] = jnp.zeros_like(sum_ref)
        sq_ref[...] = jnp.zeros_like(sq_ref)

    @pl.when(pass_idx == 0)
    def _():
        sum_ref[...] += jnp.sum(y, axis=0, keepdims=True)
        sq_ref[...] += jnp.sum(y * y, axis=0, keepdims=True)

    # ---- end of pass 0: fold BN into a single per-channel scale / shift ----
    @pl.when((pass_idx == 0) & (tile_idx == num_tiles - 1))
    def _():
        gb = gb_ref[...]
        mean = sum_ref[...] * inv_m
        var = jnp.maximum(sq_ref[...] * inv_m - mean * mean, 0.0)
        inv_std = jax.lax.rsqrt(var + BN_EPS)
        scale = gb[0:1, :] * inv_std          # gamma * rsqrt(var + eps)
        scale_ref[...] = scale
        shift_ref[...] = gb[1:2, :] - mean * scale

    # ---- pass 1: normalize (single FMA) + ReLU, lane-dense store ----
    @pl.when(pass_idx == 1)
    def _():
        out = jnp.maximum(y * scale_ref[...] + shift_ref[...], 0.0)
        if mask_rows:
            # Zero out padded rows so they do not pollute the next layer's stats.
            row = tile_idx * tm + jax.lax.broadcasted_iota(jnp.int32, out.shape, 0)
            out = jnp.where(row < m_true, out, 0.0)
        o_ref[...] = out.astype(o_ref.dtype)


@functools.partial(jax.jit, static_argnames=("m_true", "tm"))
def _run_layer(x_p, w_p, gb, *, m_true, tm):
    m_pad, cp = x_p.shape
    num_tiles = m_pad // tm
    kernel = functools.partial(
        _mlp_layer_kernel,
        inv_m=1.0 / float(m_true),
        tm=tm,
        m_true=m_true,
        mask_rows=(m_pad > m_true),
    )
    return pl.pallas_call(
        kernel,
        out_shape=jax.ShapeDtypeStruct((m_pad, cp), jnp.float32),
        grid_spec=pltpu.PrefetchScalarGridSpec(
            num_scalar_prefetch=0,
            grid=(2, num_tiles),          # (pass, m_tile); m_tile iterates fastest
            in_specs=[
                pl.BlockSpec((tm, cp), lambda p, i: (i, 0)),     # activations
                pl.BlockSpec((cp, cp), lambda p, i: (0, 0)),     # weight (resident)
                pl.BlockSpec((2, cp), lambda p, i: (0, 0)),      # packed gamma/beta
            ],
            # During the stats pass all steps alias output block 0 (never
            # written -> no writeback); pass 1 writes every block exactly once.
            out_specs=pl.BlockSpec((tm, cp), lambda p, i: (i * p, 0)),
            scratch_shapes=[
                pltpu.VMEM((1, cp), jnp.float32),   # sum
                pltpu.VMEM((1, cp), jnp.float32),   # sum of squares
                pltpu.VMEM((1, cp), jnp.float32),   # folded scale
                pltpu.VMEM((1, cp), jnp.float32),   # folded shift
            ],
        ),
        compiler_params=pltpu.CompilerParams(
            dimension_semantics=("arbitrary", "arbitrary"),
            vmem_limit_bytes=32 * 1024 * 1024,
        ),
    )(x_p, w_p, gb)


def init_mlp_params(key, in_channels, out_channels):
    """Deterministic parameter init matching the shapes of the PyTorch MLP."""
    channels = [in_channels] + list(out_channels)
    params = []
    for i in range(1, len(channels)):
        cin, cout = channels[i - 1], channels[i]
        key, kw, kb = jax.random.split(key, 3)
        bound = 1.0 / jnp.sqrt(float(cin))
        w = jax.random.uniform(kw, (cout, cin), jnp.float32, -bound, bound)
        b = jax.random.uniform(kb, (cout,), jnp.float32, -bound, bound)
        gamma = jnp.ones((cout,), jnp.float32)
        beta = jnp.zeros((cout,), jnp.float32)
        params.append({"w": w, "b": b, "gamma": gamma, "beta": beta})
    return params


def mlp_forward(x_nchw, params):
    """Forward pass of MLP on an NCHW tensor using the Pallas kernel per layer."""
    n, c, h, w = x_nchw.shape
    m = n * h * w
    x_flat = jnp.transpose(x_nchw, (0, 2, 3, 1)).reshape(m, c).astype(jnp.float32)

    # Uniform lane-padded channel width for the whole chain.
    max_c = max([c] + [layer["w"].shape[0] for layer in params])
    cp = _round_up(max_c, C_LANE)

    tm = min(TM_TARGET, _round_up(m, 8))
    m_pad = _round_up(m, tm)

    # Zero-pad rows and channels once; padded rows contribute 0 to the stats
    # (we divide by the true M inside the kernel) and are sliced off at the end.
    x_p = jnp.zeros((m_pad, cp), jnp.float32).at[:m, :c].set(x_flat)

    for layer in params:
        cout, cin = layer["w"].shape
        w_p = jnp.zeros((cp, cp), jnp.float32).at[:cin, :cout].set(
            jnp.transpose(layer["w"]))
        gb = jnp.zeros((2, cp), jnp.float32)
        gb = gb.at[0, :cout].set(layer["gamma"]).at[1, :cout].set(layer["beta"])
        # NOTE: the conv bias is intentionally NOT passed into the kernel: a
        # bias added right before training-mode BatchNorm cancels exactly in
        # the mean-centering, so it is pure wasted DMA + VALU work.
        x_p = _run_layer(x_p, w_p, gb, m_true=m, tm=tm)

    cout_last = params[-1]["w"].shape[0]
    out = x_p[:m, :cout_last]
    return jnp.transpose(out.reshape(n, h, w, cout_last), (0, 3, 1, 2))


def mlp_reference(x_nchw, params):
    """Pure-JAX reference of the PyTorch MLP forward (with conv bias + BN)."""
    x = x_nchw
    for layer in params:
        y = jnp.einsum("nchw,oc->nohw", x, layer["w"]) + layer["b"][None, :, None, None]
        mean = jnp.mean(y, axis=(0, 2, 3), keepdims=True)
        var = jnp.mean((y - mean) ** 2, axis=(0, 2, 3), keepdims=True)
        y = (y - mean) / jnp.sqrt(var + BN_EPS)
        y = y * layer["gamma"][None, :, None, None] + layer["beta"][None, :, None, None]
        x = jnp.maximum(y, 0.0)
    return x


if __name__ == "__main__":
    key = jax.random.PRNGKey(0)
    kx, kp, kx2 = jax.random.split(key, 3)

    # Primary check: batch=2, in_channels=4, spatial=16x16, out_channels=[32, 16]
    N, C, H, W = 2, 4, 16, 16
    out_channels = [32, 16]

    x = jax.random.normal(kx, (N, C, H, W), jnp.float32)
    params = init_mlp_params(kp, C, out_channels)

    out = jax.block_until_ready(mlp_forward(x, params))
    ref = mlp_reference(x, params)
    assert out.shape == (N, out_channels[-1], H, W), out.shape
    assert jnp.allclose(out, ref, atol=1e-3, rtol=1e-3), float(
        jnp.max(jnp.abs(out - ref)))

    # Secondary check: exercises multi-tile stats accumulation + row masking
    # (M = 3200 -> two M-tiles of 2048 with zero-padded tail rows).
    N2, H2, W2 = 2, 40, 40
    x2 = jax.random.normal(kx2, (N2, C, H2, W2), jnp.float32)
    out2 = jax.block_until_ready(mlp_forward(x2, params))
    ref2 = mlp_reference(x2, params)
    assert out2.shape == (N2, out_channels[-1], H2, W2), out2.shape
    assert jnp.allclose(out2, ref2, atol=1e-3, rtol=1e-3), float(
        jnp.max(jnp.abs(out2 - ref2)))

    print("KERNEL_OK")
</pallas_src>

<mosaic_0001>
module attributes {stable_mosaic.version = 11 : i64} {
  func.func @_mlp_layer_kernel(%arg0: i32, %arg1: i32, %arg2: memref<512x128xf32, #tpu.memory_space<vmem>>, %arg3: memref<128x128xf32, #tpu.memory_space<vmem>>, %arg4: memref<2x128xf32, #tpu.memory_space<vmem>>, %arg5: memref<512x128xf32, #tpu.memory_space<vmem>>, %arg6: memref<1x128xf32, #tpu.memory_space<vmem>>, %arg7: memref<1x128xf32, #tpu.memory_space<vmem>>, %arg8: memref<1x128xf32, #tpu.memory_space<vmem>>, %arg9: memref<1x128xf32, #tpu.memory_space<vmem>>) attributes {dimension_semantics = [#tpu.dimension_semantics<arbitrary>, #tpu.dimension_semantics<arbitrary>], iteration_bounds = array<i64: 2, 1>, scalar_prefetch = 0 : i64, scratch_operands = 4 : i64, tpu.core_type = #tpu.core_type<tc>, window_params = [{transform_indices = @transform_0, window_bounds = array<i64: 512, 128>}, {pipeline_mode = #tpu.pipeline_mode<synchronous>, transform_indices = @transform_1, window_bounds = array<i64: 128, 128>}, {pipeline_mode = #tpu.pipeline_mode<synchronous>, transform_indices = @transform_2, window_bounds = array<i64: 2, 128>}, {transform_indices = @transform_3, window_bounds = array<i64: 512, 128>}]} {
    %c0 = arith.constant 0 : index
    %c0_0 = arith.constant 0 : index
    %0 = vector.load %arg2[%c0, %c0_0] : memref<512x128xf32, #tpu.memory_space<vmem>>, vector<512x128xf32>
    %c0_1 = arith.constant 0 : index
    %c0_2 = arith.constant 0 : index
    %1 = vector.load %arg3[%c0_1, %c0_2] : memref<128x128xf32, #tpu.memory_space<vmem>>, vector<128x128xf32>
    %cst = arith.constant dense<0.000000e+00> : vector<512x128xf32>
    %2 = tpu.matmul %0, %1, %cst {dimension_numbers = #tpu.dot_dimension_numbers<[1], [0], [0], [1], [0, 0, 1, 1], [], []>} : vector<512x128xf32>, vector<128x128xf32>, vector<512x128xf32> -> vector<512x128xf32>
    %c0_i32 = arith.constant 0 : i32
    %3 = arith.cmpi eq, %arg0, %c0_i32 : i32
    %c0_i32_3 = arith.constant 0 : i32
    %4 = arith.cmpi eq, %arg1, %c0_i32_3 : i32
    %5 = arith.andi %3, %4 : i1
    %6 = arith.extui %5 : i1 to i32
    %c0_i32_4 = arith.constant 0 : i32
    %7 = arith.cmpi ne, %6, %c0_i32_4 : i32
    scf.if %7 {
      %cst_11 = arith.constant 0.000000e+00 : f32
      %19 = vector.broadcast %cst_11 : f32 to vector<1x128xf32>
      %c0_12 = arith.constant 0 : index
      %c0_13 = arith.constant 0 : index
      %20 = vector.load %arg6[%c0_12, %c0_13] : memref<1x128xf32, #tpu.memory_space<vmem>>, vector<1x128xf32>
      tpu.vector_store %arg6[%c0_12, %c0_13], %19 {strides = array<i32>} : memref<1x128xf32, #tpu.memory_space<vmem>>, vector<1x128xf32>,
      %cst_14 = arith.constant 0.000000e+00 : f32
      %21 = vector.broadcast %cst_14 : f32 to vector<1x128xf32>
      %c0_15 = arith.constant 0 : index
      %c0_16 = arith.constant 0 : index
      %22 = vector.load %arg7[%c0_15, %c0_16] : memref<1x128xf32, #tpu.memory_space<vmem>>, vector<1x128xf32>
      tpu.vector_store %arg7[%c0_15, %c0_16], %21 {strides = array<i32>} : memref<1x128xf32, #tpu.memory_space<vmem>>, vector<1x128xf32>,
    } else {
    }
    %c0_i32_5 = arith.constant 0 : i32
    %8 = arith.cmpi eq, %arg0, %c0_i32_5 : i32
    %9 = arith.extui %8 : i1 to i32
    %c0_i32_6 = arith.constant 0 : i32
    %10 = arith.cmpi ne, %9, %c0_i32_6 : i32
    scf.if %10 {
      %c0_11 = arith.constant 0 : index
      %c0_12 = arith.constant 0 : index
      %19 = vector.load %arg6[%c0_11, %c0_12] : memref<1x128xf32, #tpu.memory_space<vmem>>, vector<1x128xf32>
      %cst_13 = arith.constant dense<0.000000e+00> : vector<128xf32>
      %20 = vector.multi_reduction <add>, %2, %cst_13 [0] : vector<512x128xf32> to vector<128xf32>
      %21 = vector.shape_cast %20 : vector<128xf32> to vector<1x128xf32>
      %22 = arith.addf %19, %21 : vector<1x128xf32>
      %c0_14 = arith.constant 0 : index
      %c0_15 = arith.constant 0 : index
      %23 = vector.load %arg6[%c0_14, %c0_15] : memref<1x128xf32, #tpu.memory_space<vmem>>, vector<1x128xf32>
      tpu.vector_store %arg6[%c0_14, %c0_15], %22 {strides = array<i32>} : memref<1x128xf32, #tpu.memory_space<vmem>>, vector<1x128xf32>,
      %c0_16 = arith.constant 0 : index
      %c0_17 = arith.constant 0 : index
      %24 = vector.load %arg7[%c0_16, %c0_17] : memref<1x128xf32, #tpu.memory_space<vmem>>, vector<1x128xf32>
      %25 = arith.mulf %2, %2 : vector<512x128xf32>
      %cst_18 = arith.constant dense<0.000000e+00> : vector<128xf32>
      %26 = vector.multi_reduction <add>, %25, %cst_18 [0] : vector<512x128xf32> to vector<128xf32>
      %27 = vector.shape_cast %26 : vector<128xf32> to vector<1x128xf32>
      %28 = arith.addf %24, %27 : vector<1x128xf32>
      %c0_19 = arith.constant 0 : index
      %c0_20 = arith.constant 0 : index
      %29 = vector.load %arg7[%c0_19, %c0_20] : memref<1x128xf32, #tpu.memory_space<vmem>>, vector<1x128xf32>
      tpu.vector_store %arg7[%c0_19, %c0_20], %28 {strides = array<i32>} : memref<1x128xf32, #tpu.memory_space<vmem>>, vector<1x128xf32>,
    } else {
    }
    %c0_i32_7 = arith.constant 0 : i32
    %11 = arith.cmpi eq, %arg0, %c0_i32_7 : i32
    %c0_i32_8 = arith.constant 0 : i32
    %12 = arith.cmpi eq, %arg1, %c0_i32_8 : i32
    %13 = arith.andi %11, %12 : i1
    %14 = arith.extui %13 : i1 to i32
    %c0_i32_9 = arith.constant 0 : i32
    %15 = arith.cmpi ne, %14, %c0_i32_9 : i32
    scf.if %15 {
      %c0_11 = arith.constant 0 : index
      %c0_12 = arith.constant 0 : index
      %19 = vector.load %arg4[%c0_11, %c0_12] : memref<2x128xf32, #tpu.memory_space<vmem>>, vector<2x128xf32>
      %c0_13 = arith.constant 0 : index
      %c0_14 = arith.constant 0 : index
      %20 = vector.load %arg6[%c0_13, %c0_14] : memref<1x128xf32, #tpu.memory_space<vmem>>, vector<1x128xf32>
      %cst_15 = arith.constant 0.001953125 : f32
      %21 = vector.broadcast %cst_15 : f32 to vector<1x128xf32>
      %22 = arith.mulf %20, %21 : vector<1x128xf32>
      %c0_16 = arith.constant 0 : index
      %c0_17 = arith.constant 0 : index
      %23 = vector.load %arg7[%c0_16, %c0_17] : memref<1x128xf32, #tpu.memory_space<vmem>>, vector<1x128xf32>
      %cst_18 = arith.constant 0.001953125 : f32
      %24 = vector.broadcast %cst_18 : f32 to vector<1x128xf32>
      %25 = arith.mulf %23, %24 : vector<1x128xf32>
      %26 = arith.mulf %22, %22 : vector<1x128xf32>
      %27 = arith.subf %25, %26 : vector<1x128xf32>
      %cst_19 = arith.constant 0.000000e+00 : f32
      %28 = vector.broadcast %cst_19 : f32 to vector<1x128xf32>
      %29 = arith.maximumf %27, %28 : vector<1x128xf32>
      %cst_20 = arith.constant 9.99999974E-6 : f32
      %30 = vector.broadcast %cst_20 : f32 to vector<1x128xf32>
      %31 = arith.addf %29, %30 : vector<1x128xf32>
      %32 = math.rsqrt %31 : vector<1x128xf32>
      %33 = vector.extract_strided_slice %19 {offsets = [0, 0], sizes = [1, 128], strides = [1, 1]} : vector<2x128xf32> to vector<1x128xf32>
      %34 = arith.mulf %33, %32 : vector<1x128xf32>
      %c0_21 = arith.constant 0 : index
      %c0_22 = arith.constant 0 : index
      %35 = vector.load %arg8[%c0_21, %c0_22] : memref<1x128xf32, #tpu.memory_space<vmem>>, vector<1x128xf32>
      tpu.vector_store %arg8[%c0_21, %c0_22], %34 {strides = array<i32>} : memref<1x128xf32, #tpu.memory_space<vmem>>, vector<1x128xf32>,
      %36 = vector.extract_strided_slice %19 {offsets = [1, 0], sizes = [1, 128], strides = [1, 1]} : vector<2x128xf32> to vector<1x128xf32>
      %37 = arith.mulf %22, %34 : vector<1x128xf32>
      %38 = arith.subf %36, %37 : vector<1x128xf32>
      %c0_23 = arith.constant 0 : index
      %c0_24 = arith.constant 0 : index
      %39 = vector.load %arg9[%c0_23, %c0_24] : memref<1x128xf32, #tpu.memory_space<vmem>>, vector<1x128xf32>
      tpu.vector_store %arg9[%c0_23, %c0_24], %38 {strides = array<i32>} : memref<1x128xf32, #tpu.memory_space<vmem>>, vector<1x128xf32>,
    } else {
    }
    %c1_i32 = arith.constant 1 : i32
    %16 = arith.cmpi eq, %arg0, %c1_i32 : i32
    %17 = arith.extui %16 : i1 to i32
    %c0_i32_10 = arith.constant 0 : i32
    %18 = arith.cmpi ne, %17, %c0_i32_10 : i32
    scf.if %18 {
      %c0_11 = arith.constant 0 : index
      %c0_12 = arith.constant 0 : index
      %19 = vector.load %arg8[%c0_11, %c0_12] : memref<1x128xf32, #tpu.memory_space<vmem>>, vector<1x128xf32>
      %20 = vector.broadcast %19 : vector<1x128xf32> to vector<512x128xf32>
      %21 = arith.mulf %2, %20 : vector<512x128xf32>
      %c0_13 = arith.constant 0 : index
      %c0_14 = arith.constant 0 : index
      %22 = vector.load %arg9[%c0_13, %c0_14] : memref<1x128xf32, #tpu.memory_space<vmem>>, vector<1x128xf32>
      %23 = vector.broadcast %22 : vector<1x128xf32> to vector<512x128xf32>
      %24 = arith.addf %21, %23 : vector<512x128xf32>
      %cst_15 = arith.constant 0.000000e+00 : f32
      %25 = vector.broadcast %cst_15 : f32 to vector<512x128xf32>
      %26 = arith.maximumf %24, %25 : vector<512x128xf32>
      %c0_16 = arith.constant 0 : index
      %c0_17 = arith.constant 0 : index
      %27 = vector.load %arg5[%c0_16, %c0_17] : memref<512x128xf32, #tpu.memory_space<vmem>>, vector<512x128xf32>
      tpu.vector_store %arg5[%c0_16, %c0_17], %26 {strides = array<i32>} : memref<512x128xf32, #tpu.memory_space<vmem>>, vector<512x128xf32>,
    } else {
    }
    return
  }
  func.func @transform_0(%arg0: i32, %arg1: i32) -> (i32, i32) {
    %c0_i32 = arith.constant 0 : i32
    %c0_i32_0 = arith.constant 0 : i32
    return %arg1, %c0_i32 : i32, i32
  }
  func.func @transform_1(%arg0: i32, %arg1: i32) -> (i32, i32) {
    %c0_i32 = arith.constant 0 : i32
    %c0_i32_0 = arith.constant 0 : i32
    %c0_i32_1 = arith.constant 0 : i32
    return %c0_i32, %c0_i32_0 : i32, i32
  }
  func.func @transform_2(%arg0: i32, %arg1: i32) -> (i32, i32) {
    %c0_i32 = arith.constant 0 : i32
    %c0_i32_0 = arith.constant 0 : i32
    %c0_i32_1 = arith.constant 0 : i32
    return %c0_i32, %c0_i32_0 : i32, i32
  }
  func.func @transform_3(%arg0: i32, %arg1: i32) -> (i32, i32) {
    %0 = arith.muli %arg1, %arg0 : i32
    %c0_i32 = arith.constant 0 : i32
    %c0_i32_0 = arith.constant 0 : i32
    return %0, %c0_i32 : i32, i32
  }
}

</mosaic_0001>

<bundles_post_ra>
// kernel: _run_layer.1
= control target key start
LH: loop header
LB: loop body
LE: loop exit
PB: predicated region body
PF: predicated region fallthrough
CT: control target
= control target key end

     0   :  { %8 = vsyncpa [#allocation7], 0  ;;  %s2068_s0 = inlined_call_operand.hbm [shape: f32[512,128], index: 0, kind: input, shape index: {}]   ;;  %s2069_s1 = inlined_call_operand.hbm [shape: f32[128,128], index: 1, kind: input, shape index: {}]   ;;  %s2070_s2 = inlined_call_operand.hbm [shape: f32[2,128], index: 2, kind: input, shape index: {}]   ;;  %s2071_s3 = inlined_call_operand.hbm [shape: f32[512,128], index: 3, kind: output, shape index: {}]  }
   0x1   :  { %9 = vsyncpa [#allocation10], 0 }
   0x2   :  { %10 = vsyncpa [#allocation8], 0 }
   0x3   :  { %12 = vsyncpa [#allocation8 + $0x1], 0  ;;  %s1460_s12 = smov 0   ;;  %s1462_s13 = smov 0  }
   0x4   :  { %s1464_s14 = smov 0  }
   0x5 LB: > { %s1135_s15 = sadd.s32 4294967295, %s1429_s14   ;;  %s1136_s16 = sadd.s32 4294967294, %s1429_s14   ;;  %s1429_s14 = sphi %s1464_s14, %s18_s14   ;;  %s1425_s13 = sphi %s1462_s13, %s2160_s13   ;;  %s1421_s12 = sphi %s1460_s12, %s2159_s12  }
   0x6   : > { %p1137_p0 = scmp.ge.s32.totalorder %s1429_s14, 1  ;;  %p131_p1 = scmp.lt.s32.totalorder %s1429_s14, 3 }
   0x7   : > { %p1481_p2 = scmp.eq.s32.totalorder %s1135_s15, 0  ;;  %s159_s21 = sshll.u32 %s2069_s1, 4  ;;  %s160_s21 = int_to_ptr.hbm [resolvable:$true] %s159_s21 }
   0x8   : > { %p1485_p3 = pnand %p1137_p0, %p131_p1  ;;  %s1431_s22 = smov [#allocation9]  }
   0x9   : > { %s161_s23 = sshll.u32 %s1431_s22, 4  ;;  %s30_s25 = sadd.s32 1, %s1425_s13  ;;  %s162_s23 = int_to_ptr.vmem [resolvable:$true] %s161_s23 }
   0xa   : > { %p1217_p4 = pneg %p1485_p3  ;;  %s1432_s26 = smov 128  }
   0xb   : > { %s1433_s27 = smov 8   ;;  %p32_p6 = scmp.ge.s32.totalorder %s30_s25, 2 }
   0xc   : > { %p1496_p5 = pnand %p1481_p2, %p1217_p4  ;;  %s145_s30 = sshll.u32 %s2068_s0, 4  ;;  %s146_s30 = int_to_ptr.hbm [resolvable:$true] %s145_s30 }
   0xd   : > { %s2162_s25 = smov (%p32_p6, %s30_s25), 0  ;;  %s1434_s4 = smov [#allocation6]  }
   0xe   : > { %1223 = dma.hbm_to_vmem [thread:$0]  (!%p1496_p5), %s160_s21, 2048, %s162_s23, [#allocation10], %s1432_s26, %s1432_s26, %s1433_s27  }
   0xf   : > { %s147_s5 = sshll.u32 %s1434_s4, 4  ;;  %s174_s8 = sshll.u32 %s2070_s2, 4  ;;  %s148_s5 = int_to_ptr.vmem [resolvable:$true] %s147_s5  ;;  %s175_s8 = int_to_ptr.hbm [resolvable:$true] %s174_s8 }
  0x10   : > { %1220 = dma.hbm_to_vmem [thread:$0]  (!%p1496_p5), %s146_s30, 8192, %s148_s5, [#allocation7], %s1432_s26, %s1432_s26, %s1433_s27  }
  0x11   : > { %s1435_s9 = smov [#allocation11]   ;;  %189 = sbr.rel (%p1485_p3) target bundleno = 585 (0x249), region = 32 }
  0x12   : > { %s176_s10 = sshll.u32 %s1435_s9, 4  ;;  %s177_s10 = int_to_ptr.vmem [resolvable:$true] %s176_s10 }
  0x13   : > { %1226 = dma.hbm_to_vmem [thread:$0]  (!%p1496_p5), %s175_s8, 32, %s177_s10, [#allocation10]  }
  0x16   : > { %1408 = dma.done.wait (%p1481_p2), [#allocation7], 8192  }
  0x17   : > { %1410 = vsyncadd (%p1481_p2), [#allocation7], 4294959104 }
  0x18   : > { %1412 = dma.done.wait (%p1481_p2), [#allocation10], 2080  }
  0x19   : > { %1414 = vsyncadd (%p1481_p2), [#allocation10], 4294965216  ;;  %v301_v0 = vld [vmem:[#allocation9 + $0x78] sm:$0xff]  ;;  %v300_v1 = vld [vmem:[#allocation9 + $0x70] sm:$0xff]  ;;  %p511_p7 = scmp.eq.s32.totalorder %s1421_s12, 0 }
  0x1a   : > { %1154 = vmatpush.msra.mxu2 %v301_v0  ;;  %1155 = vmatpush.msra.mxu3 %v301_v0  ;;  %v299_v2 = vld [vmem:[#allocation9 + $0x68] sm:$0xff]  ;;  %v298_v3 = vld [vmem:[#allocation9 + $0x60] sm:$0xff]  ;;  %v297_v4 = vld [vmem:[#allocation9 + $0x58] sm:$0xff] }
  0x1b   : > { %302 = vmatpush.msra.mxu0 %v301_v0  ;;  %1153 = vmatpush.msra.mxu1 %v301_v0  ;;  %v296_v5 = vld [vmem:[#allocation9 + $0x50] sm:$0xff]  ;;  %v295_v6 = vld [vmem:[#allocation9 + $0x48] sm:$0xff]  ;;  %v294_v7 = vld [vmem:[#allocation9 + $0x40] sm:$0xff] }
  0x1c   : > { %1157 = vmatpush.msra.mxu2 %v300_v1  ;;  %1158 = vmatpush.msra.mxu3 %v300_v1  ;;  %v293_v8 = vld [vmem:[#allocation9 + $0x38] sm:$0xff]  ;;  %v292_v9 = vld [vmem:[#allocation9 + $0x30] sm:$0xff]  ;;  %v291_v10 = vld [vmem:[#allocation9 + $0x28] sm:$0xff] }
  0x1d   : > { %303 = vmatpush.msra.mxu0 %v300_v1  ;;  %1156 = vmatpush.msra.mxu1 %v300_v1  ;;  %v290_v11 = vld [vmem:[#allocation9 + $0x20] sm:$0xff]  ;;  %v289_v12 = vld [vmem:[#allocation9 + $0x18] sm:$0xff]  ;;  %v288_v13 = vld [vmem:[#allocation9 + $0x10] sm:$0xff] }
  0x1e   : > { %1160 = vmatpush.msra.mxu2 %v299_v2  ;;  %1161 = vmatpush.msra.mxu3 %v299_v2  ;;  %v287_v14 = vld [vmem:[#allocation9 + $0x8] sm:$0xff]  ;;  %v286_v15 = vld [vmem:[#allocation9] sm:$0xff]  ;;  %v256_v24 = vld [vmem:[#allocation6 + $0x110] sm:$0xff] }
  0x1f   : > { %304 = vmatpush.msra.mxu0 %v299_v2  ;;  %1159 = vmatpush.msra.mxu1 %v299_v2  ;;  %v254_v16 = vld [vmem:[#allocation6 + $0x100] sm:$0xff]  ;;  %v255_v20 = vld [vmem:[#allocation6 + $0x108] sm:$0xff]  ;;  %v272_v25 = vld [vmem:[#allocation6 + $0x190] sm:$0xff] }
  0x20   : > { %1163 = vmatpush.msra.mxu2 %v298_v3  ;;  %1164 = vmatpush.msra.mxu3 %v298_v3  ;;  %v270_v17 = vld [vmem:[#allocation6 + $0x180] sm:$0xff]  ;;  %v271_v21 = vld [vmem:[#allocation6 + $0x188] sm:$0xff]  ;;  %v224_v26 = vld [vmem:[#allocation6 + $0x10] sm:$0xff] }
  0x21   : > { %305 = vmatpush.msra.mxu0 %v298_v3  ;;  %1162 = vmatpush.msra.mxu1 %v298_v3  ;;  %v222_v18 = vld [vmem:[#allocation6] sm:$0xff]  ;;  %v223_v22 = vld [vmem:[#allocation6 + $0x8] sm:$0xff]  ;;  %v240_v27 = vld [vmem:[#allocation6 + $0x90] sm:$0xff] }
  0x22   : > { %1166 = vmatpush.msra.mxu2 %v297_v4  ;;  %1167 = vmatpush.msra.mxu3 %v297_v4  ;;  %v238_v19 = vld [vmem:[#allocation6 + $0x80] sm:$0xff]  ;;  %v239_v23 = vld [vmem:[#allocation6 + $0x88] sm:$0xff]  ;;  %v257_v28 = vld [vmem:[#allocation6 + $0x118] sm:$0xff] }
  0x23   : > { %306 = vmatpush.msra.mxu0 %v297_v4  ;;  %1165 = vmatpush.msra.mxu1 %v297_v4  ;;  %v273_v29 = vld [vmem:[#allocation6 + $0x198] sm:$0xff]  ;;  %v258_v32 = vld [vmem:[#allocation6 + $0x120] sm:$0xff]  ;;  %v259_v36 = vld [vmem:[#allocation6 + $0x128] sm:$0xff] }
  0x24   : > { %1169 = vmatpush.msra.mxu2 %v296_v5  ;;  %1170 = vmatpush.msra.mxu3 %v296_v5  ;;  %v225_v30 = vld [vmem:[#allocation6 + $0x18] sm:$0xff]  ;;  %v274_v33 = vld [vmem:[#allocation6 + $0x1a0] sm:$0xff]  ;;  %v275_v37 = vld [vmem:[#allocation6 + $0x1a8] sm:$0xff] }
  0x25   : > { %307 = vmatpush.msra.mxu0 %v296_v5  ;;  %1168 = vmatpush.msra.mxu1 %v296_v5  ;;  %v241_v31 = vld [vmem:[#allocation6 + $0x98] sm:$0xff]  ;;  %v226_v34 = vld [vmem:[#allocation6 + $0x20] sm:$0xff]  ;;  %v227_v38 = vld [vmem:[#allocation6 + $0x28] sm:$0xff] }
  0x26   : > { %1172 = vmatpush.msra.mxu2 %v295_v6  ;;  %1173 = vmatpush.msra.mxu3 %v295_v6  ;;  %v242_v35 = vld [vmem:[#allocation6 + $0xa0] sm:$0xff]  ;;  %v243_v39 = vld [vmem:[#allocation6 + $0xa8] sm:$0xff]  ;;  %v260_v40 = vld [vmem:[#allocation6 + $0x130] sm:$0xff] }
  0x27   : > { %308 = vmatpush.msra.mxu0 %v295_v6  ;;  %1171 = vmatpush.msra.mxu1 %v295_v6  ;;  %v276_v41 = vld [vmem:[#allocation6 + $0x1b0] sm:$0xff]  ;;  %v261_v44 = vld [vmem:[#allocation6 + $0x138] sm:$0xff]  ;;  %v262_v48 = vld [vmem:[#allocation6 + $0x140] sm:$0xff] }
  0x28   : > { %1175 = vmatpush.msra.mxu2 %v294_v7  ;;  %1176 = vmatpush.msra.mxu3 %v294_v7  ;;  %v228_v42 = vld [vmem:[#allocation6 + $0x30] sm:$0xff]  ;;  %v277_v45 = vld [vmem:[#allocation6 + $0x1b8] sm:$0xff]  ;;  %v278_v49 = vld [vmem:[#allocation6 + $0x1c0] sm:$0xff] }
  0x29   : > { %309 = vmatpush.msra.mxu0 %v294_v7  ;;  %1174 = vmatpush.msra.mxu1 %v294_v7  ;;  %v244_v43 = vld [vmem:[#allocation6 + $0xb0] sm:$0xff]  ;;  %v229_v46 = vld [vmem:[#allocation6 + $0x38] sm:$0xff]  ;;  %v230_v50 = vld [vmem:[#allocation6 + $0x40] sm:$0xff] }
  0x2a   : > { %1178 = vmatpush.msra.mxu2 %v293_v8  ;;  %1179 = vmatpush.msra.mxu3 %v293_v8  ;;  %v245_v47 = vld [vmem:[#allocation6 + $0xb8] sm:$0xff]  ;;  %v246_v51 = vld [vmem:[#allocation6 + $0xc0] sm:$0xff]  ;;  %v263_v52 = vld [vmem:[#allocation6 + $0x148] sm:$0xff] }
  0x2b   : > { %310 = vmatpush.msra.mxu0 %v293_v8  ;;  %1177 = vmatpush.msra.mxu1 %v293_v8  ;;  %v279_v53 = vld [vmem:[#allocation6 + $0x1c8] sm:$0xff]  ;;  %v264_v56 = vld [vmem:[#allocation6 + $0x150] sm:$0xff]  ;;  %v265_v60 = vld [vmem:[#allocation6 + $0x158] sm:$0xff] }
  0x2c   : > { %1181 = vmatpush.msra.mxu2 %v292_v9  ;;  %1182 = vmatpush.msra.mxu3 %v292_v9  ;;  %v231_v54 = vld [vmem:[#allocation6 + $0x48] sm:$0xff]  ;;  %v280_v57 = vld [vmem:[#allocation6 + $0x1d0] sm:$0xff]  ;;  %v281_v61 = vld [vmem:[#allocation6 + $0x1d8] sm:$0xff] }
  0x2d   : > { %311 = vmatpush.msra.mxu0 %v292_v9  ;;  %1180 = vmatpush.msra.mxu1 %v292_v9  ;;  %v247_v55 = vld [vmem:[#allocation6 + $0xc8] sm:$0xff]  ;;  %v232_v58 = vld [vmem:[#allocation6 + $0x50] sm:$0xff]  ;;  %v233_v62 = vld [vmem:[#allocation6 + $0x58] sm:$0xff] }
  0x2e   : > { %1184 = vmatpush.msra.mxu2 %v291_v10  ;;  %1185 = vmatpush.msra.mxu3 %v291_v10  ;;  %v248_v59 = vld [vmem:[#allocation6 + $0xd0] sm:$0xff]  ;;  %v249_v63 = vld [vmem:[#allocation6 + $0xd8] sm:$0xff]  ;;  %v266_v0 = vld [vmem:[#allocation6 + $0x160] sm:$0xff] }
  0x2f   : > { %312 = vmatpush.msra.mxu0 %v291_v10  ;;  %1183 = vmatpush.msra.mxu1 %v291_v10  ;;  %v282_v1 = vld [vmem:[#allocation6 + $0x1e0] sm:$0xff]  ;;  %v267_v4 = vld [vmem:[#allocation6 + $0x168] sm:$0xff]  ;;  %v268_v8 = vld [vmem:[#allocation6 + $0x170] sm:$0xff] }
  0x30   : > { %1187 = vmatpush.msra.mxu2 %v290_v11  ;;  %1188 = vmatpush.msra.mxu3 %v290_v11  ;;  %v234_v2 = vld [vmem:[#allocation6 + $0x60] sm:$0xff]  ;;  %v283_v5 = vld [vmem:[#allocation6 + $0x1e8] sm:$0xff]  ;;  %v284_v9 = vld [vmem:[#allocation6 + $0x1f0] sm:$0xff] }
  0x31   : > { %313 = vmatpush.msra.mxu0 %v290_v11  ;;  %1186 = vmatpush.msra.mxu1 %v290_v11  ;;  %v250_v3 = vld [vmem:[#allocation6 + $0xe0] sm:$0xff]  ;;  %v235_v6 = vld [vmem:[#allocation6 + $0x68] sm:$0xff]  ;;  %v236_v10 = vld [vmem:[#allocation6 + $0x70] sm:$0xff] }
  0x32   : > { %1190 = vmatpush.msra.mxu2 %v289_v12  ;;  %1191 = vmatpush.msra.mxu3 %v289_v12  ;;  %v251_v7 = vld [vmem:[#allocation6 + $0xe8] sm:$0xff]  ;;  %v252_v11 = vld [vmem:[#allocation6 + $0xf0] sm:$0xff] }
  0x33   : > { %314 = vmatpush.msra.mxu0 %v289_v12  ;;  %1189 = vmatpush.msra.mxu1 %v289_v12  ;;  %v269_v12 = vld [vmem:[#allocation6 + $0x178] sm:$0xff] }
  0x34   : > { %1193 = vmatpush.msra.mxu2 %v288_v13  ;;  %1194 = vmatpush.msra.mxu3 %v288_v13 }
  0x35   : > { %315 = vmatpush.msra.mxu0 %v288_v13  ;;  %1192 = vmatpush.msra.mxu1 %v288_v13  ;;  %v285_v13 = vld [vmem:[#allocation6 + $0x1f8] sm:$0xff] }
  0x36   : > { %1196 = vmatpush.msra.mxu2 %v287_v14  ;;  %1197 = vmatpush.msra.mxu3 %v287_v14 }
  0x37   : > { %316 = vmatpush.msra.mxu0 %v287_v14  ;;  %1195 = vmatpush.msra.mxu1 %v287_v14  ;;  %v237_v14 = vld [vmem:[#allocation6 + $0x78] sm:$0xff] }
  0x38   : > { %1199 = vmatpush.msra.mxu2 %v286_v15  ;;  %1200 = vmatpush.msra.mxu3 %v286_v15 }
  0x39   : > { %414 = vmatmul.f32.vlgmr.msra.gmra.mxu2 %v254_v16  ;;  %462 = vmatmul.f32.vlgmr.msra.gmra.mxu3 %v270_v17 }
  0x3a   : > { %317 = vmatpush.msra.mxu0 %v286_v15  ;;  %1198 = vmatpush.msra.mxu1 %v286_v15  ;;  %v253_v15 = vld [vmem:[#allocation6 + $0xf8] sm:$0xff] }
  0x3b   : > { %318 = vmatmul.f32.vlgmr.msra.gmra.mxu0 %v222_v18  ;;  %366 = vmatmul.f32.vlgmr.msra.gmra.mxu1 %v238_v19 }
  0x41   : > { %417 = vmatmul.f32.gmra.mxu2 %v255_v20  ;;  %465 = vmatmul.f32.gmra.mxu3 %v271_v21 }
  0x43   : > { %321 = vmatmul.f32.gmra.mxu0 %v223_v22  ;;  %369 = vmatmul.f32.gmra.mxu1 %v239_v23 }
  0x49   : > { %420 = vmatmul.f32.gmra.mxu2 %v256_v24  ;;  %468 = vmatmul.f32.gmra.mxu3 %v272_v25 }
  0x4b   : > { %324 = vmatmul.f32.gmra.mxu0 %v224_v26  ;;  %372 = vmatmul.f32.gmra.mxu1 %v240_v27 }
  0x51   : > { %423 = vmatmul.f32.gmra.mxu2 %v257_v28  ;;  %471 = vmatmul.f32.gmra.mxu3 %v273_v29 }
  0x53   : > { %327 = vmatmul.f32.gmra.mxu0 %v225_v30  ;;  %375 = vmatmul.f32.gmra.mxu1 %v241_v31 }
  0x59   : > { %426 = vmatmul.f32.gmra.mxu2 %v258_v32  ;;  %474 = vmatmul.f32.gmra.mxu3 %v274_v33 }
  0x5b   : > { %330 = vmatmul.f32.gmra.mxu0 %v226_v34  ;;  %378 = vmatmul.f32.gmra.mxu1 %v242_v35 }
  0x61   : > { %429 = vmatmul.f32.gmra.mxu2 %v259_v36  ;;  %477 = vmatmul.f32.gmra.mxu3 %v275_v37 }
  0x63   : > { %333 = vmatmul.f32.gmra.mxu0 %v227_v38  ;;  %381 = vmatmul.f32.gmra.mxu1 %v243_v39 }
  0x69   : > { %432 = vmatmul.f32.gmra.mxu2 %v260_v40  ;;  %480 = vmatmul.f32.gmra.mxu3 %v276_v41 }
  0x6b   : > { %336 = vmatmul.f32.gmra.mxu0 %v228_v42  ;;  %384 = vmatmul.f32.gmra.mxu1 %v244_v43 }
  0x71   : > { %435 = vmatmul.f32.gmra.mxu2 %v261_v44  ;;  %483 = vmatmul.f32.gmra.mxu3 %v277_v45 }
  0x73   : > { %339 = vmatmul.f32.gmra.mxu0 %v229_v46  ;;  %387 = vmatmul.f32.gmra.mxu1 %v245_v47 }
  0x79   : > { %438 = vmatmul.f32.gmra.mxu2 %v262_v48  ;;  %486 = vmatmul.f32.gmra.mxu3 %v278_v49 }
  0x7b   : > { %342 = vmatmul.f32.gmra.mxu0 %v230_v50  ;;  %390 = vmatmul.f32.gmra.mxu1 %v246_v51 }
  0x81   : > { %441 = vmatmul.f32.gmra.mxu2 %v263_v52  ;;  %489 = vmatmul.f32.gmra.mxu3 %v279_v53 }
  0x83   : > { %345 = vmatmul.f32.gmra.mxu0 %v231_v54  ;;  %393 = vmatmul.f32.gmra.mxu1 %v247_v55 }
  0x89   : > { %444 = vmatmul.f32.gmra.mxu2 %v264_v56  ;;  %492 = vmatmul.f32.gmra.mxu3 %v280_v57 }
  0x8b   : > { %348 = vmatmul.f32.gmra.mxu0 %v232_v58  ;;  %396 = vmatmul.f32.gmra.mxu1 %v248_v59 }
  0x91   : > { %447 = vmatmul.f32.gmra.mxu2 %v265_v60  ;;  %495 = vmatmul.f32.gmra.mxu3 %v281_v61 }
  0x93   : > { %351 = vmatmul.f32.gmra.mxu0 %v233_v62  ;;  %399 = vmatmul.f32.gmra.mxu1 %v249_v63 }
  0x99   : > { %450 = vmatmul.f32.gmra.mxu2 %v266_v0  ;;  %498 = vmatmul.f32.gmra.mxu3 %v282_v1 }
  0x9b   : > { %354 = vmatmul.f32.gmra.mxu0 %v234_v2  ;;  %402 = vmatmul.f32.gmra.mxu1 %v250_v3 }
  0xa1   : > { %453 = vmatmul.f32.gmra.mxu2 %v267_v4  ;;  %501 = vmatmul.f32.gmra.mxu3 %v283_v5 }
  0xa3   : > { %357 = vmatmul.f32.gmra.mxu0 %v235_v6  ;;  %405 = vmatmul.f32.gmra.mxu1 %v251_v7 }
  0xa9   : > { %456 = vmatmul.f32.gmra.mxu2 %v268_v8  ;;  %504 = vmatmul.f32.gmra.mxu3 %v284_v9 }
  0xab   : > { %360 = vmatmul.f32.gmra.mxu0 %v236_v10  ;;  %408 = vmatmul.f32.gmra.mxu1 %v252_v11 }
  0xb1   : > { %459 = vmatmul.f32.gmra.mxu2 %v269_v12  ;;  %507 = vmatmul.f32.gmra.mxu3 %v285_v13 }
  0xb3   : > { %363 = vmatmul.f32.gmra.mxu0 %v237_v14  ;;  %411 = vmatmul.f32.gmra.mxu1 %v253_v15 }
  0xb8   : > { %v1526_v16 = vpop.f32.mrf.mxu0  ;;  %v1528_v17 = vpop.f32.mrf.mxu1 }
  0xb9   : > { %2099 = vst [vmem:[#allocation16_spill] sm:$0xff] %v1526_v16 }
  0xbc   : > { %v1530_v18 = vpop.f32.mrf.mxu2  ;;  %v1532_v19 = vpop.f32.mrf.mxu3 }
  0xbd   : > { %2100 = vst [vmem:[#allocation17_spill] sm:$0xff] %v1532_v19 }
  0xc0   : > { %v1534_v20 = vpop.f32.mrf.mxu0  ;;  %v1536_v21 = vpop.f32.mrf.mxu1 }
  0xc1   : > { %2101 = vst [vmem:[#allocation18_spill] sm:$0xff] %v1534_v20 }
  0xc4   : > { %v1538_v22 = vpop.f32.mrf.mxu2  ;;  %v1540_v23 = vpop.f32.mrf.mxu3 }
  0xc5   : > { %2102 = vst [vmem:[#allocation19_spill] sm:$0xff] %v1540_v23 }
  0xc8   : > { %v1542_v24 = vpop.f32.mrf.mxu0  ;;  %v1544_v25 = vpop.f32.mrf.mxu1 }
  0xc9   : > { %2103 = vst [vmem:[#allocation20_spill] sm:$0xff] %v1542_v24 }
  0xcc   : > { %v1546_v26 = vpop.f32.mrf.mxu2  ;;  %v1548_v27 = vpop.f32.mrf.mxu3 }
  0xcd   : > { %2104 = vst [vmem:[#allocation21_spill] sm:$0xff] %v1548_v27 }
  0xd0   : > { %v1550_v28 = vpop.f32.mrf.mxu0  ;;  %v1552_v29 = vpop.f32.mrf.mxu1 }
  0xd4   : > { %v1554_v30 = vpop.f32.mrf.mxu2  ;;  %v1556_v31 = vpop.f32.mrf.mxu3 }
  0xd5   : > { %2105 = vst [vmem:[#allocation22_spill] sm:$0xff] %v1556_v31 }
  0xd8   : > { %v1558_v32 = vpop.f32.mrf.mxu0  ;;  %v1560_v33 = vpop.f32.mrf.mxu1 }
  0xdc   : > { %v1562_v34 = vpop.f32.mrf.mxu2  ;;  %v1564_v35 = vpop.f32.mrf.mxu3 }
  0xdd   : > { %2106 = vst [vmem:[#allocation23_spill] sm:$0xff] %v1564_v35 }
  0xe0   : > { %v1566_v36 = vpop.f32.mrf.mxu0  ;;  %v1568_v37 = vpop.f32.mrf.mxu1 }
  0xe4   : > { %v1570_v38 = vpop.f32.mrf.mxu2  ;;  %v1572_v39 = vpop.f32.mrf.mxu3 }
  0xe5   : > { %2107 = vst [vmem:[#allocation24_spill] sm:$0xff] %v1572_v39 }
  0xe8   : > { %v1574_v40 = vpop.f32.mrf.mxu0  ;;  %v1576_v41 = vpop.f32.mrf.mxu1 }
  0xec   : > { %v1578_v42 = vpop.f32.mrf.mxu2  ;;  %v1580_v43 = vpop.f32.mrf.mxu3 }
  0xed   : > { %2108 = vst [vmem:[#allocation25_spill] sm:$0xff] %v1580_v43 }
  0xf0   : > { %v1582_v44 = vpop.f32.mrf.mxu0  ;;  %v1584_v45 = vpop.f32.mrf.mxu1 }
  0xf4   : > { %v1586_v46 = vpop.f32.mrf.mxu2  ;;  %v1588_v47 = vpop.f32.mrf.mxu3 }
  0xf5   : > { %2109 = vst [vmem:[#allocation26_spill] sm:$0xff] %v1588_v47 }
  0xf8   : > { %v1590_v48 = vpop.f32.mrf.mxu0  ;;  %v1592_v49 = vpop.f32.mrf.mxu1 }
  0xfc   : > { %v1594_v50 = vpop.f32.mrf.mxu2  ;;  %v1596_v51 = vpop.f32.mrf.mxu3 }
  0xfd   : > { %2110 = vst [vmem:[#allocation27_spill] sm:$0xff] %v1596_v51 }
 0x100   : > { %v1598_v52 = vpop.f32.mrf.mxu0  ;;  %v1600_v53 = vpop.f32.mrf.mxu1 }
 0x104   : > { %v1602_v54 = vpop.f32.mrf.mxu2  ;;  %v1604_v55 = vpop.f32.mrf.mxu3 }
 0x105   : > { %2111 = vst [vmem:[#allocation28_spill] sm:$0xff] %v1604_v55 }
 0x108   : > { %v1606_v56 = vpop.f32.mrf.mxu0  ;;  %v1608_v57 = vpop.f32.mrf.mxu1 }
 0x10c   : > { %v1610_v58 = vpop.f32.mrf.mxu2  ;;  %v1612_v59 = vpop.f32.mrf.mxu3 }
 0x10d   : > { %2112 = vst [vmem:[#allocation29_spill] sm:$0xff] %v1612_v59 }
 0x110   : > { %v1614_v60 = vpop.f32.mrf.mxu0  ;;  %v1616_v61 = vpop.f32.mrf.mxu1 }
 0x114   : > { %v1618_v62 = vpop.f32.mrf.mxu2  ;;  %v1620_v63 = vpop.f32.mrf.mxu3 }
 0x115   : > { %2113 = vst [vmem:[#allocation30_spill] sm:$0xff] %v1618_v62 }
 0x116   : > { %2114 = vst [vmem:[#allocation31_spill] sm:$0xff] %v1620_v63 }
 0x118   : > { %v1622_v0 = vpop.f32.mrf.mxu0  ;;  %v1624_v1 = vpop.f32.mrf.mxu1 }
 0x11c   : > { %v1626_v2 = vpop.f32.mrf.mxu2  ;;  %v1628_v3 = vpop.f32.mrf.mxu3 }
 0x11d   : > { %2115 = vst [vmem:[#allocation32_spill] sm:$0xff] %v1626_v2 }
 0x11e   : > { %2116 = vst [vmem:[#allocation33_spill] sm:$0xff] %v1628_v3 }
 0x120   : > { %v1630_v4 = vpop.f32.mrf.mxu0  ;;  %v1632_v5 = vpop.f32.mrf.mxu1 }
 0x124   : > { %v1634_v6 = vpop.f32.mrf.mxu2  ;;  %v1636_v7 = vpop.f32.mrf.mxu3 }
 0x125   : > { %2117 = vst [vmem:[#allocation34_spill] sm:$0xff] %v1634_v6 }
 0x126   : > { %2118 = vst [vmem:[#allocation35_spill] sm:$0xff] %v1636_v7  ;;  %v1436_v7 = vmov (%p511_p7), 0.0  }
 0x127   : > { %517 = vst [vmem:[#allocation2] sm:$0x1] (%p511_p7), %v1436_v7 }
 0x128   : > { %v1638_v8 = vpop.f32.mrf.mxu0  ;;  %v1640_v9 = vpop.f32.mrf.mxu1  ;;  %518 = vst [vmem:[#allocation3] sm:$0x1] (%p511_p7), %v1436_v7 }
 0x12c   : > { %v1642_v10 = vpop.f32.mrf.mxu2  ;;  %v1644_v11 = vpop.f32.mrf.mxu3 }
 0x12d   : > { %2119 = vst [vmem:[#allocation36_spill] sm:$0xff] %v1642_v10 }
 0x12e   : > { %2120 = vst [vmem:[#allocation37_spill] sm:$0xff] %v1644_v11 }
 0x130   : > { %v1646_v12 = vpop.f32.mrf.mxu0  ;;  %v1648_v13 = vpop.f32.mrf.mxu1 }
 0x132   : > { %516 = sbr.rel (!%p511_p7) target bundleno = 311 (0x137), region = 48 }
 0x134   : > { %v1650_v14 = vpop.f32.mrf.mxu2  ;;  %v1652_v15 = vpop.f32.mrf.mxu3 }
 0x135   : > { %2121 = vst [vmem:[#allocation38_spill] sm:$0xff] %v1650_v14 }
 0x136   : > { %2122 = vst [vmem:[#allocation39_spill] sm:$0xff] %v1652_v15 }
 0x137 PF: > { %p1146_p8 = scmp.ne.s32.totalorder %s1421_s12, 0 }
 0x139   : > { %521 = sbr.rel (%p1146_p8) target bundleno = 461 (0x1cd), region = 52 }
 0x13e   : > { %v523_v11 = vadd.f32 %v1534_v20, %v1526_v16  ;;  %v595_v3 = vmul.f32 %v1526_v16, %v1526_v16  ;;  %v596_v63 = vmul.f32 %v1534_v20, %v1534_v20  ;;  %v597_v59 = vmul.f32 %v1542_v24, %v1542_v24 }
 0x13f   : > { %v598_v55 = vmul.f32 %v1550_v28, %v1550_v28  ;;  %v599_v43 = vmul.f32 %v1558_v32, %v1558_v32 }
 0x140   : > { %v524_v15 = vadd.f32 %v523_v11, %v1542_v24  ;;  %v659_v51 = vadd.f32 %v596_v63, %v595_v3  ;;  %v600_v11 = vmul.f32 %v1566_v36, %v1566_v36  ;;  %v602_v3 = vmul.f32 %v1582_v44, %v1582_v44 }
 0x142   : > { %v525_v7 = vadd.f32 %v524_v15, %v1550_v28  ;;  %v660_v16 = vadd.f32 %v659_v51, %v597_v59  ;;  %v601_v15 = vmul.f32 %v1574_v40, %v1574_v40 }
 0x144   : > { %v526_v47 = vadd.f32 %v525_v7, %v1558_v32  ;;  %v661_v20 = vadd.f32 %v660_v16, %v598_v55 }
 0x146   : > { %v527_v39 = vadd.f32 %v526_v47, %v1566_v36  ;;  %v662_v35 = vadd.f32 %v661_v20, %v599_v43  ;;  %v603_v47 = vmul.f32 %v1590_v48, %v1590_v48 }
 0x148   : > { %v528_v24 = vadd.f32 %v527_v39, %v1574_v40  ;;  %v663_v7 = vadd.f32 %v662_v35, %v600_v11  ;;  %v604_v39 = vmul.f32 %v1598_v52, %v1598_v52  ;;  %v606_v11 = vmul.f32 %v1614_v60, %v1614_v60 }
 0x14a   : > { %v529_v63 = vadd.f32 %v528_v24, %v1582_v44  ;;  %v664_v59 = vadd.f32 %v663_v7, %v601_v15  ;;  %v605_v24 = vmul.f32 %v1606_v56, %v1606_v56  ;;  %v607_v7 = vmul.f32 %v1622_v0, %v1622_v0 }
 0x14c   : > { %v530_v51 = vadd.f32 %v529_v63, %v1590_v48  ;;  %v665_v55 = vadd.f32 %v664_v59, %v602_v3  ;;  %v608_v59 = vmul.f32 %v1630_v4, %v1630_v4 }
 0x14e   : > { %v531_v16 = vadd.f32 %v530_v51, %v1598_v52  ;;  %v666_v43 = vadd.f32 %v665_v55, %v603_v47  ;;  %v609_v55 = vmul.f32 %v1638_v8, %v1638_v8 }
 0x150   : > { %v532_v20 = vadd.f32 %v531_v16, %v1606_v56  ;;  %v667_v63 = vadd.f32 %v666_v43, %v604_v39  ;;  %v610_v43 = vmul.f32 %v1646_v12, %v1646_v12 }
 0x152   : > { %v533_v35 = vadd.f32 %v532_v20, %v1614_v60  ;;  %v668_v51 = vadd.f32 %v667_v63, %v605_v24  ;;  %v611_v63 = vmul.f32 %v1528_v17, %v1528_v17 }
 0x154   : > { %v534_v15 = vadd.f32 %v533_v35, %v1622_v0  ;;  %v669_v16 = vadd.f32 %v668_v51, %v606_v11  ;;  %v612_v51 = vmul.f32 %v1536_v21, %v1536_v21 }
 0x156   : > { %v535_v3 = vadd.f32 %v534_v15, %v1630_v4  ;;  %v670_v20 = vadd.f32 %v669_v16, %v607_v7  ;;  %v613_v16 = vmul.f32 %v1544_v25, %v1544_v25 }
 0x158   : > { %v536_v47 = vadd.f32 %v535_v3, %v1638_v8  ;;  %v671_v35 = vadd.f32 %v670_v20, %v608_v59  ;;  %v614_v20 = vmul.f32 %v1552_v29, %v1552_v29 }
 0x15a   : > { %v537_v39 = vadd.f32 %v536_v47, %v1646_v12  ;;  %v672_v15 = vadd.f32 %v671_v35, %v609_v55  ;;  %v615_v35 = vmul.f32 %v1560_v33, %v1560_v33 }
 0x15c   : > { %v538_v24 = vadd.f32 %v537_v39, %v1528_v17  ;;  %v673_v3 = vadd.f32 %v672_v15, %v610_v43  ;;  %v616_v15 = vmul.f32 %v1568_v37, %v1568_v37 }
 0x15e   : > { %v539_v11 = vadd.f32 %v538_v24, %v1536_v21  ;;  %v674_v47 = vadd.f32 %v673_v3, %v611_v63  ;;  %v617_v3 = vmul.f32 %v1576_v41, %v1576_v41 }
 0x160   : > { %v540_v7 = vadd.f32 %v539_v11, %v1544_v25  ;;  %v675_v39 = vadd.f32 %v674_v47, %v612_v51  ;;  %v618_v47 = vmul.f32 %v1584_v45, %v1584_v45 }
 0x162   : > { %v541_v59 = vadd.f32 %v540_v7, %v1552_v29  ;;  %v676_v24 = vadd.f32 %v675_v39, %v613_v16  ;;  %v619_v39 = vmul.f32 %v1592_v49, %v1592_v49 }
 0x164   : > { %v542_v55 = vadd.f32 %v541_v59, %v1560_v33  ;;  %v677_v11 = vadd.f32 %v676_v24, %v614_v20  ;;  %v620_v24 = vmul.f32 %v1600_v53, %v1600_v53 }
 0x166   : > { %v543_v43 = vadd.f32 %v542_v55, %v1568_v37  ;;  %v678_v7 = vadd.f32 %v677_v11, %v615_v35  ;;  %v621_v11 = vmul.f32 %v1608_v57, %v1608_v57 }
 0x168   : > { %v544_v63 = vadd.f32 %v543_v43, %v1576_v41  ;;  %v679_v59 = vadd.f32 %v678_v7, %v616_v15  ;;  %v622_v7 = vmul.f32 %v1616_v61, %v1616_v61 }
 0x16a   : > { %v545_v51 = vadd.f32 %v544_v63, %v1584_v45  ;;  %v680_v55 = vadd.f32 %v679_v59, %v617_v3  ;;  %v623_v59 = vmul.f32 %v1624_v1, %v1624_v1 }
 0x16c   : > { %v546_v16 = vadd.f32 %v545_v51, %v1592_v49  ;;  %v681_v43 = vadd.f32 %v680_v55, %v618_v47  ;;  %v624_v55 = vmul.f32 %v1632_v5, %v1632_v5 }
 0x16e   : > { %v547_v20 = vadd.f32 %v546_v16, %v1600_v53  ;;  %v682_v63 = vadd.f32 %v681_v43, %v619_v39  ;;  %v625_v43 = vmul.f32 %v1640_v9, %v1640_v9 }
 0x170   : > { %v548_v35 = vadd.f32 %v547_v20, %v1608_v57  ;;  %v683_v51 = vadd.f32 %v682_v63, %v620_v24  ;;  %v626_v63 = vmul.f32 %v1648_v13, %v1648_v13 }
 0x172   : > { %v549_v15 = vadd.f32 %v548_v35, %v1616_v61  ;;  %v684_v16 = vadd.f32 %v683_v51, %v621_v11  ;;  %v627_v51 = vmul.f32 %v1530_v18, %v1530_v18 }
 0x174   : > { %v550_v3 = vadd.f32 %v549_v15, %v1624_v1  ;;  %v685_v20 = vadd.f32 %v684_v16, %v622_v7  ;;  %v628_v16 = vmul.f32 %v1538_v22, %v1538_v22 }
 0x176   : > { %v551_v47 = vadd.f32 %v550_v3, %v1632_v5  ;;  %v686_v35 = vadd.f32 %v685_v20, %v623_v59  ;;  %v629_v20 = vmul.f32 %v1546_v26, %v1546_v26 }
 0x178   : > { %v552_v39 = vadd.f32 %v551_v47, %v1640_v9  ;;  %v687_v15 = vadd.f32 %v686_v35, %v624_v55  ;;  %v630_v35 = vmul.f32 %v1554_v30, %v1554_v30 }
 0x17a   : > { %v553_v24 = vadd.f32 %v552_v39, %v1648_v13  ;;  %v688_v3 = vadd.f32 %v687_v15, %v625_v43  ;;  %v631_v15 = vmul.f32 %v1562_v34, %v1562_v34 }
 0x17c   : > { %v554_v11 = vadd.f32 %v553_v24, %v1530_v18  ;;  %v689_v47 = vadd.f32 %v688_v3, %v626_v63  ;;  %v632_v3 = vmul.f32 %v1570_v38, %v1570_v38 }
 0x17e   : > { %v555_v7 = vadd.f32 %v554_v11, %v1538_v22  ;;  %v690_v39 = vadd.f32 %v689_v47, %v627_v51  ;;  %v633_v47 = vmul.f32 %v1578_v42, %v1578_v42 }
 0x180   : > { %v556_v59 = vadd.f32 %v555_v7, %v1546_v26  ;;  %v691_v24 = vadd.f32 %v690_v39, %v628_v16  ;;  %v634_v39 = vmul.f32 %v1586_v46, %v1586_v46 }
 0x182   : > { %v557_v55 = vadd.f32 %v556_v59, %v1554_v30  ;;  %v692_v11 = vadd.f32 %v691_v24, %v629_v20  ;;  %v635_v24 = vmul.f32 %v1594_v50, %v1594_v50 }
 0x184   : > { %v558_v43 = vadd.f32 %v557_v55, %v1562_v34  ;;  %v693_v7 = vadd.f32 %v692_v11, %v630_v35  ;;  %v636_v11 = vmul.f32 %v1602_v54, %v1602_v54 }
 0x186   : > { %v559_v63 = vadd.f32 %v558_v43, %v1570_v38  ;;  %v694_v59 = vadd.f32 %v693_v7, %v631_v15  ;;  %v637_v7 = vmul.f32 %v1610_v58, %v1610_v58 }
 0x188   : > { %v560_v51 = vadd.f32 %v559_v63, %v1578_v42  ;;  %v695_v55 = vadd.f32 %v694_v59, %v632_v3  ;;  %v638_v59 = vmul.f32 %v1618_v62, %v1618_v62 }
 0x18a   : > { %v561_v16 = vadd.f32 %v560_v51, %v1586_v46  ;;  %v696_v43 = vadd.f32 %v695_v55, %v633_v47  ;;  %v639_v55 = vmul.f32 %v1626_v2, %v1626_v2 }
 0x18c   : > { %v562_v20 = vadd.f32 %v561_v16, %v1594_v50  ;;  %v697_v63 = vadd.f32 %v696_v43, %v634_v39  ;;  %v640_v43 = vmul.f32 %v1634_v6, %v1634_v6 }
 0x18e   : > { %v563_v35 = vadd.f32 %v562_v20, %v1602_v54  ;;  %v698_v51 = vadd.f32 %v697_v63, %v635_v24  ;;  %v641_v63 = vmul.f32 %v1642_v10, %v1642_v10 }
 0x190   : > { %v564_v15 = vadd.f32 %v563_v35, %v1610_v58  ;;  %v699_v16 = vadd.f32 %v698_v51, %v636_v11  ;;  %v642_v51 = vmul.f32 %v1650_v14, %v1650_v14 }
 0x192   : > { %v565_v3 = vadd.f32 %v564_v15, %v1618_v62  ;;  %v700_v20 = vadd.f32 %v699_v16, %v637_v7  ;;  %v643_v16 = vmul.f32 %v1532_v19, %v1532_v19 }
 0x194   : > { %v566_v47 = vadd.f32 %v565_v3, %v1626_v2  ;;  %v701_v35 = vadd.f32 %v700_v20, %v638_v59  ;;  %v644_v20 = vmul.f32 %v1540_v23, %v1540_v23 }
 0x196   : > { %v567_v39 = vadd.f32 %v566_v47, %v1634_v6  ;;  %v702_v15 = vadd.f32 %v701_v35, %v639_v55  ;;  %v645_v35 = vmul.f32 %v1548_v27, %v1548_v27 }
 0x198   : > { %v568_v24 = vadd.f32 %v567_v39, %v1642_v10  ;;  %v703_v3 = vadd.f32 %v702_v15, %v640_v43  ;;  %v646_v15 = vmul.f32 %v1556_v31, %v1556_v31 }
 0x19a   : > { %v569_v11 = vadd.f32 %v568_v24, %v1650_v14  ;;  %v704_v47 = vadd.f32 %v703_v3, %v641_v63 }
 0x19c   : > { %v570_v7 = vadd.f32 %v569_v11, %v1532_v19  ;;  %v705_v39 = vadd.f32 %v704_v47, %v642_v51  ;;  %v2123_v19 = vld [vmem:[#allocation23_spill] sm:$0xff] }
 0x19d   : > { %v647_v3 = vmul.f32 %v2123_v19, %v2123_v19 }
 0x19e   : > { %v571_v59 = vadd.f32 %v570_v7, %v1540_v23  ;;  %v706_v24 = vadd.f32 %v705_v39, %v643_v16  ;;  %v2124_v23 = vld [vmem:[#allocation24_spill] sm:$0xff] }
 0x19f   : > { %v648_v47 = vmul.f32 %v2124_v23, %v2124_v23 }
 0x1a0   : > { %v572_v55 = vadd.f32 %v571_v59, %v1548_v27  ;;  %v707_v11 = vadd.f32 %v706_v24, %v644_v20  ;;  %v2125_v27 = vld [vmem:[#allocation25_spill] sm:$0xff] }
 0x1a1   : > { %v649_v39 = vmul.f32 %v2125_v27, %v2125_v27 }
 0x1a2   : > { %v573_v43 = vadd.f32 %v572_v55, %v1556_v31  ;;  %v708_v7 = vadd.f32 %v707_v11, %v645_v35  ;;  %v2126_v31 = vld [vmem:[#allocation26_spill] sm:$0xff] }
 0x1a3   : > { %v650_v24 = vmul.f32 %v2126_v31, %v2126_v31 }
 0x1a4   : > { %v574_v63 = vadd.f32 %v573_v43, %v2123_v19  ;;  %v709_v59 = vadd.f32 %v708_v7, %v646_v15  ;;  %v2127_v19 = vld [vmem:[#allocation27_spill] sm:$0xff] }
 0x1a5   : > { %v651_v11 = vmul.f32 %v2127_v19, %v2127_v19 }
 0x1a6   : > { %v575_v51 = vadd.f32 %v574_v63, %v2124_v23  ;;  %v710_v55 = vadd.f32 %v709_v59, %v647_v3  ;;  %v2128_v23 = vld [vmem:[#allocation28_spill] sm:$0xff] }
 0x1a7   : > { %v652_v7 = vmul.f32 %v2128_v23, %v2128_v23 }
 0x1a8   : > { %v576_v16 = vadd.f32 %v575_v51, %v2125_v27  ;;  %v711_v43 = vadd.f32 %v710_v55, %v648_v47  ;;  %v2129_v27 = vld [vmem:[#allocation29_spill] sm:$0xff] }
 0x1a9   : > { %v653_v59 = vmul.f32 %v2129_v27, %v2129_v27 }
 0x1aa   : > { %v577_v20 = vadd.f32 %v576_v16, %v2126_v31  ;;  %v712_v63 = vadd.f32 %v711_v43, %v649_v39  ;;  %v2130_v31 = vld [vmem:[#allocation31_spill] sm:$0xff] }
 0x1ab   : > { %v654_v55 = vmul.f32 %v2130_v31, %v2130_v31 }
 0x1ac   : > { %v578_v35 = vadd.f32 %v577_v20, %v2127_v19  ;;  %v713_v51 = vadd.f32 %v712_v63, %v650_v24  ;;  %v2131_v19 = vld [vmem:[#allocation33_spill] sm:$0xff] }
 0x1ad   : > { %v655_v43 = vmul.f32 %v2131_v19, %v2131_v19 }
 0x1ae   : > { %v579_v15 = vadd.f32 %v578_v35, %v2128_v23  ;;  %v714_v16 = vadd.f32 %v713_v51, %v651_v11  ;;  %v2132_v23 = vld [vmem:[#allocation35_spill] sm:$0xff] }
 0x1af   : > { %v656_v63 = vmul.f32 %v2132_v23, %v2132_v23 }
 0x1b0   : > { %v580_v3 = vadd.f32 %v579_v15, %v2129_v27  ;;  %v715_v20 = vadd.f32 %v714_v16, %v652_v7  ;;  %v2133_v27 = vld [vmem:[#allocation37_spill] sm:$0xff] }
 0x1b1   : > { %v657_v51 = vmul.f32 %v2133_v27, %v2133_v27 }
 0x1b2   : > { %v581_v47 = vadd.f32 %v580_v3, %v2130_v31  ;;  %v716_v35 = vadd.f32 %v715_v20, %v653_v59  ;;  %v2134_v31 = vld [vmem:[#allocation39_spill] sm:$0xff] }
 0x1b3   : > { %v658_v16 = vmul.f32 %v2134_v31, %v2134_v31 }
 0x1b4   : > { %v582_v39 = vadd.f32 %v581_v47, %v2131_v19  ;;  %v717_v15 = vadd.f32 %v716_v35, %v654_v55 }
 0x1b6   : > { %v583_v24 = vadd.f32 %v582_v39, %v2132_v23  ;;  %v718_v3 = vadd.f32 %v717_v15, %v655_v43 }
 0x1b8   : > { %v584_v11 = vadd.f32 %v583_v24, %v2133_v27  ;;  %v719_v47 = vadd.f32 %v718_v3, %v656_v63  ;;  %v522_v24 = vld [vmem:[#allocation2] sm:$0x1] }
 0x1ba   : > { %v585_v7 = vadd.f32 %v584_v11, %v2134_v31  ;;  %v720_v59 = vadd.f32 %v719_v47, %v657_v51  ;;  %v594_v11 = vld [vmem:[#allocation3] sm:$0x1] }
 0x1bc   : > { %v586_v19 = vrot.slane %v585_v7, 4  ;;  %v721_v39 = vadd.f32 %v720_v59, %v658_v16 }
 0x1be   : > { %v587_v20 = vadd.f32 %v586_v19, %v585_v7  ;;  %v722_v10 = vrot.slane %v721_v39, 4 }
 0x1c0   : > { %v588_v14 = vrot.slane %v587_v20, 2  ;;  %v723_v55 = vadd.f32 %v722_v10, %v721_v39 }
 0x1c2   : > { %v589_v23 = vadd.f32 %v588_v14, %v587_v20  ;;  %v724_v6 = vrot.slane %v723_v55, 2 }
 0x1c4   : > { %v590_v35 = vrot.slane %v589_v23, 1  ;;  %v725_v27 = vadd.f32 %v724_v6, %v723_v55 }
 0x1c6   : > { %v591_v2 = vadd.f32 %v590_v35, %v589_v23  ;;  %v726_v15 = vrot.slane %v725_v27, 1 }
 0x1c8   : > { %v592_v43 = vadd.f32 %v591_v2, %v522_v24  ;;  %v727_v62 = vadd.f32 %v726_v15, %v725_v27 }
 0x1ca   : > { %593 = vst [vmem:[#allocation2] sm:$0x1] %v592_v43  ;;  %v728_v31 = vadd.f32 %v727_v62, %v594_v11 }
 0x1cc   : > { %729 = vst [vmem:[#allocation3] sm:$0x1] %v728_v31 }
 0x1cd PF: > { %731 = sbr.rel (!%p511_p7) target bundleno = 503 (0x1f7), region = 56  ;;  %v732_v20 = vld [vmem:[#allocation11] sm:$0x3] (%p511_p7) }
 0x1d1   : > { %v733_v63 = vld [vmem:[#allocation2] sm:$0x1] (%p511_p7) }
 0x1d2   : > { %v734_v14 = vmul.f32 0.001953125, %v733_v63 }
 0x1d3   : > { %v735_v51 = vld [vmem:[#allocation3] sm:$0x1] }
 0x1d4   : > { %v736_v10 = vmul.f32 0.001953125, %v735_v51  ;;  %v737_v3 = vmul.f32 %v734_v14, %v734_v14 }
 0x1d6   : > { %v738_v7 = vsub.f32 %v736_v10, %v737_v3 }
 0x1d8   : > { %v739_v16 = vmax.f32 %v738_v7, 0.0 }
 0x1da   : > { %v740_v47 = vadd.f32 1e-05, %v739_v16 }
 0x1dc   : > { %1273 = vrsqrt.f32 %v740_v47  ;;  %vm747_vm0 = vweird.f32 %v740_v47 }
 0x1e2   : > { %v1274_v2 = vpop.eup %1273 }
 0x1e3   : > { %v742_v6 = vmul.f32 %v1274_v2, %v740_v47  ;;  %vm748_vm1 = vweird.f32 %v1274_v2 }
 0x1e4   : > { %vm749_vm2 = vmor %vm747_vm0, %vm748_vm1 }
 0x1e5   : > { %v743_v19 = vmul.f32 %v1274_v2, %v742_v6 }
 0x1e7   : > { %v744_v59 = vmul.f32 0.5, %v743_v19 }
 0x1e9   : > { %v745_v62 = vsub.f32 1.5, %v744_v59 }
 0x1eb   : > { %v746_v39 = vmul.f32 %v1274_v2, %v745_v62 }
 0x1ed   : > { %v750_v23 = vsel %vm749_vm2, %v1274_v2, %v746_v39 }
 0x1ee   : > { %v751_v55 = vmul.f32 %v750_v23, %v732_v20 }
 0x1f0   : > { %752 = vst [vmem:[#allocation4] sm:$0x1] %v751_v55  ;;  %v753_v35 = vmul.f32 %v751_v55, %v734_v14 }
 0x1f2   : > { %v755_v24 = vperm.slane %v753_v35, 0 }
 0x1f4   : > { %v757_v27 = vsub.f32 %v732_v20, %v755_v24 }
 0x1f6   : > { %758 = vst [vmem:[#allocation5 - $0x1] sm:$0x2] %v757_v27 }
 0x1f7 PF: > { %p1147_p9 = scmp.ne.s32.totalorder %s1421_s12, 1 }
 0x1f9   : > { %762 = sbr.rel (%p1147_p9) target bundleno = 581 (0x245), region = 60 }
 0x1fe   : > { %v1852_v43 = vld [vmem:[#allocation4] ss:$0 sm:$0xff]  ;;  %v1854_v15 = vld [vmem:[#allocation5] ss:$0 sm:$0xff]  ;;  %v2135_v11 = vld [vmem:[#allocation16_spill] sm:$0xff] }
 0x1ff   : > { %v767_v31 = vmul.f32 %v1852_v43, %v2135_v11  ;;  %v2136_v63 = vld [vmem:[#allocation18_spill] sm:$0xff]  ;;  %v2137_v10 = vld [vmem:[#allocation20_spill] sm:$0xff]  ;;  %v770_v3 = vmul.f32 %v1852_v43, %v1550_v28  ;;  %v771_v7 = vmul.f32 %v1852_v43, %v1558_v32  ;;  %v772_v16 = vmul.f32 %v1852_v43, %v1566_v36 }
 0x200   : > { %v768_v51 = vmul.f32 %v1852_v43, %v2136_v63  ;;  %v769_v14 = vmul.f32 %v1852_v43, %v2137_v10  ;;  %v773_v47 = vmul.f32 %v1852_v43, %v1574_v40  ;;  %v774_v2 = vmul.f32 %v1852_v43, %v1582_v44 }
 0x201   : > { %v835_v6 = vadd.f32 %v1854_v15, %v767_v31  ;;  %v838_v28 = vadd.f32 %v1854_v15, %v770_v3  ;;  %v839_v62 = vadd.f32 %v1854_v15, %v771_v7  ;;  %v840_v32 = vadd.f32 %v1854_v15, %v772_v16 }
 0x202   : > { %v836_v19 = vadd.f32 %v1854_v15, %v768_v51  ;;  %v837_v59 = vadd.f32 %v1854_v15, %v769_v14  ;;  %v841_v40 = vadd.f32 %v1854_v15, %v773_v47  ;;  %v842_v44 = vadd.f32 %v1854_v15, %v774_v2 }
 0x203   : > { %v899_v20 = vmax.f32 %v835_v6, 0.0  ;;  %v902_v23 = vmax.f32 %v838_v28, 0.0  ;;  %v903_v55 = vmax.f32 %v839_v62, 0.0  ;;  %v775_v35 = vmul.f32 %v1852_v43, %v1590_v48 }
 0x204   : > { %v900_v36 = vmax.f32 %v836_v19, 0.0  ;;  %v901_v39 = vmax.f32 %v837_v59, 0.0  ;;  %v776_v24 = vmul.f32 %v1852_v43, %v1598_v52  ;;  %v777_v27 = vmul.f32 %v1852_v43, %v1606_v56 }
 0x205   : > { %963 = vst [vmem:[#allocation12] sm:$0xff] %v899_v20  ;;  %v778_v11 = vmul.f32 %v1852_v43, %v1614_v60  ;;  %v904_v31 = vmax.f32 %v840_v32, 0.0  ;;  %v779_v63 = vmul.f32 %v1852_v43, %v1622_v0  ;;  %v780_v51 = vmul.f32 %v1852_v43, %v1630_v4 }
 0x206   : > { %964 = vst [vmem:[#allocation12 + $0x8] sm:$0xff] %v900_v36  ;;  %v781_v48 = vmul.f32 %v1852_v43, %v1638_v8  ;;  %v905_v10 = vmax.f32 %v841_v40, 0.0  ;;  %v843_v52 = vadd.f32 %v1854_v15, %v775_v35  ;;  %v844_v56 = vadd.f32 %v1854_v15, %v776_v24 }
 0x207   : > { %965 = vst [vmem:[#allocation12 + $0x10] sm:$0xff] %v901_v39  ;;  %v845_v14 = vadd.f32 %v1854_v15, %v777_v27  ;;  %v906_v60 = vmax.f32 %v842_v44, 0.0  ;;  %v846_v3 = vadd.f32 %v1854_v15, %v778_v11  ;;  %v782_v0 = vmul.f32 %v1852_v43, %v1646_v12 }
 0x208   : > { %966 = vst [vmem:[#allocation12 + $0x18] sm:$0xff] %v902_v23  ;;  %v907_v4 = vmax.f32 %v843_v52, 0.0  ;;  %v847_v7 = vadd.f32 %v1854_v15, %v779_v63  ;;  %v908_v8 = vmax.f32 %v844_v56, 0.0  ;;  %v848_v16 = vadd.f32 %v1854_v15, %v780_v51 }
 0x209   : > { %967 = vst [vmem:[#allocation12 + $0x20] sm:$0xff] %v903_v55  ;;  %v849_v47 = vadd.f32 %v1854_v15, %v781_v48  ;;  %v909_v2 = vmax.f32 %v845_v14, 0.0  ;;  %v783_v6 = vmul.f32 %v1852_v43, %v1528_v17  ;;  %v784_v19 = vmul.f32 %v1852_v43, %v1536_v21 }
 0x20a   : > { %968 = vst [vmem:[#allocation12 + $0x28] sm:$0xff] %v904_v31  ;;  %v785_v12 = vmul.f32 %v1852_v43, %v1544_v25  ;;  %v910_v59 = vmax.f32 %v846_v3, 0.0  ;;  %v850_v28 = vadd.f32 %v1854_v15, %v782_v0  ;;  %v786_v62 = vmul.f32 %v1852_v43, %v1552_v29 }
 0x20b   : > { %969 = vst [vmem:[#allocation12 + $0x30] sm:$0xff] %v905_v10  ;;  %v911_v32 = vmax.f32 %v847_v7, 0.0  ;;  %v851_v20 = vadd.f32 %v1854_v15, %v783_v6  ;;  %v787_v17 = vmul.f32 %v1852_v43, %v1560_v33  ;;  %v912_v36 = vmax.f32 %v848_v16, 0.0 }
 0x20c   : > { %970 = vst [vmem:[#allocation12 + $0x38] sm:$0xff] %v906_v60  ;;  %v852_v21 = vadd.f32 %v1854_v15, %v784_v19  ;;  %v788_v25 = vmul.f32 %v1852_v43, %v1568_v37  ;;  %v913_v39 = vmax.f32 %v849_v47, 0.0  ;;  %v853_v40 = vadd.f32 %v1854_v15, %v785_v12 }
 0x20d   : > { %971 = vst [vmem:[#allocation12 + $0x40] sm:$0xff] %v907_v4  ;;  %v789_v29 = vmul.f32 %v1852_v43, %v1576_v41  ;;  %v914_v23 = vmax.f32 %v850_v28, 0.0  ;;  %v854_v55 = vadd.f32 %v1854_v15, %v786_v62  ;;  %v790_v33 = vmul.f32 %v1852_v43, %v1584_v45 }
 0x20e   : > { %972 = vst [vmem:[#allocation12 + $0x48] sm:$0xff] %v908_v8  ;;  %v915_v44 = vmax.f32 %v851_v20, 0.0  ;;  %v855_v35 = vadd.f32 %v1854_v15, %v787_v17  ;;  %v791_v37 = vmul.f32 %v1852_v43, %v1592_v49  ;;  %v916_v24 = vmax.f32 %v852_v21, 0.0 }
 0x20f   : > { %973 = vst [vmem:[#allocation12 + $0x50] sm:$0xff] %v909_v2  ;;  %v856_v27 = vadd.f32 %v1854_v15, %v788_v25  ;;  %v792_v41 = vmul.f32 %v1852_v43, %v1600_v53  ;;  %v917_v11 = vmax.f32 %v853_v40, 0.0  ;;  %v857_v31 = vadd.f32 %v1854_v15, %v789_v29 }
 0x210   : > { %974 = vst [vmem:[#allocation12 + $0x58] sm:$0xff] %v910_v59  ;;  %v793_v45 = vmul.f32 %v1852_v43, %v1608_v57  ;;  %v918_v63 = vmax.f32 %v854_v55, 0.0  ;;  %v858_v51 = vadd.f32 %v1854_v15, %v790_v33  ;;  %v794_v49 = vmul.f32 %v1852_v43, %v1616_v61 }
 0x211   : > { %975 = vst [vmem:[#allocation12 + $0x60] sm:$0xff] %v911_v32  ;;  %v919_v48 = vmax.f32 %v855_v35, 0.0  ;;  %v859_v10 = vadd.f32 %v1854_v15, %v791_v37  ;;  %v795_v53 = vmul.f32 %v1852_v43, %v1624_v1  ;;  %v920_v52 = vmax.f32 %v856_v27, 0.0 }
 0x212   : > { %976 = vst [vmem:[#allocation12 + $0x68] sm:$0xff] %v912_v36  ;;  %v860_v56 = vadd.f32 %v1854_v15, %v792_v41  ;;  %v796_v57 = vmul.f32 %v1852_v43, %v1632_v5  ;;  %v921_v14 = vmax.f32 %v857_v31, 0.0  ;;  %v861_v60 = vadd.f32 %v1854_v15, %v793_v45 }
 0x213   : > { %977 = vst [vmem:[#allocation12 + $0x70] sm:$0xff] %v913_v39  ;;  %v797_v61 = vmul.f32 %v1852_v43, %v1640_v9  ;;  %v922_v3 = vmax.f32 %v858_v51, 0.0  ;;  %v862_v0 = vadd.f32 %v1854_v15, %v794_v49  ;;  %v798_v1 = vmul.f32 %v1852_v43, %v1648_v13 }
 0x214   : > { %978 = vst [vmem:[#allocation12 + $0x78] sm:$0xff] %v914_v23  ;;  %v923_v4 = vmax.f32 %v859_v10, 0.0  ;;  %v863_v7 = vadd.f32 %v1854_v15, %v795_v53  ;;  %v799_v5 = vmul.f32 %v1852_v43, %v1530_v18  ;;  %v924_v8 = vmax.f32 %v860_v56, 0.0  ;;  %v2142_v10 = vld [vmem:[#allocation38_spill] sm:$0xff] }
 0x215   : > { %979 = vst [vmem:[#allocation12 + $0x80] sm:$0xff] %v915_v44  ;;  %v864_v16 = vadd.f32 %v1854_v15, %v796_v57  ;;  %v800_v9 = vmul.f32 %v1852_v43, %v1538_v22  ;;  %v925_v47 = vmax.f32 %v861_v60, 0.0  ;;  %v865_v2 = vadd.f32 %v1854_v15, %v797_v61  ;;  %v2138_v44 = vld [vmem:[#allocation30_spill] sm:$0xff]  ;;  %v2143_v57 = vld [vmem:[#allocation17_spill] sm:$0xff] }
 0x216   : > { %980 = vst [vmem:[#allocation12 + $0x88] sm:$0xff] %v916_v24  ;;  %v801_v13 = vmul.f32 %v1852_v43, %v1546_v26  ;;  %v926_v6 = vmax.f32 %v862_v0, 0.0  ;;  %v866_v19 = vadd.f32 %v1854_v15, %v798_v1  ;;  %v802_v18 = vmul.f32 %v1852_v43, %v1554_v30  ;;  %v2139_v24 = vld [vmem:[#allocation32_spill] sm:$0xff]  ;;  %v2145_v1 = vld [vmem:[#allocation39_spill] sm:$0xff] }
 0x217   : > { %981 = vst [vmem:[#allocation12 + $0x90] sm:$0xff] %v917_v11  ;;  %v927_v12 = vmax.f32 %v863_v7, 0.0  ;;  %v867_v59 = vadd.f32 %v1854_v15, %v799_v5  ;;  %v803_v22 = vmul.f32 %v1852_v43, %v1562_v34  ;;  %v928_v28 = vmax.f32 %v864_v16, 0.0  ;;  %v2140_v11 = vld [vmem:[#allocation34_spill] sm:$0xff] }
 0x218   : > { %982 = vst [vmem:[#allocation12 + $0x98] sm:$0xff] %v918_v63  ;;  %v868_v62 = vadd.f32 %v1854_v15, %v800_v9  ;;  %v804_v26 = vmul.f32 %v1852_v43, %v1570_v38  ;;  %v929_v32 = vmax.f32 %v865_v2, 0.0  ;;  %v869_v20 = vadd.f32 %v1854_v15, %v801_v13  ;;  %v2141_v63 = vld [vmem:[#allocation36_spill] sm:$0xff]  ;;  %v2147_v2 = vld [vmem:[#allocation22_spill] sm:$0xff] }
 0x219   : > { %983 = vst [vmem:[#allocation12 + $0xa0] sm:$0xff] %v919_v48  ;;  %v805_v30 = vmul.f32 %v1852_v43, %v1578_v42  ;;  %v930_v17 = vmax.f32 %v866_v19, 0.0  ;;  %v870_v36 = vadd.f32 %v1854_v15, %v802_v18  ;;  %v806_v34 = vmul.f32 %v1852_v43, %v1586_v46 }
 0x21a   : > { %984 = vst [vmem:[#allocation12 + $0xa8] sm:$0xff] %v920_v52  ;;  %v931_v21 = vmax.f32 %v867_v59, 0.0  ;;  %v871_v25 = vadd.f32 %v1854_v15, %v803_v22  ;;  %v807_v38 = vmul.f32 %v1852_v43, %v1594_v50  ;;  %v932_v39 = vmax.f32 %v868_v62, 0.0  ;;  %v2149_v62 = vld [vmem:[#allocation24_spill] sm:$0xff] }
 0x21b   : > { %985 = vst [vmem:[#allocation12 + $0xb0] sm:$0xff] %v921_v14  ;;  %v872_v40 = vadd.f32 %v1854_v15, %v804_v26  ;;  %v808_v42 = vmul.f32 %v1852_v43, %v1602_v54  ;;  %v933_v29 = vmax.f32 %v869_v20, 0.0  ;;  %v873_v23 = vadd.f32 %v1854_v15, %v805_v30  ;;  %v2150_v30 = vld [vmem:[#allocation25_spill] sm:$0xff] }
 0x21c   : > { %986 = vst [vmem:[#allocation12 + $0xb8] sm:$0xff] %v922_v3  ;;  %v809_v46 = vmul.f32 %v1852_v43, %v1610_v58  ;;  %v934_v55 = vmax.f32 %v870_v36, 0.0  ;;  %v874_v33 = vadd.f32 %v1854_v15, %v806_v34  ;;  %v810_v50 = vmul.f32 %v1852_v43, %v2138_v44  ;;  %v2144_v3 = vld [vmem:[#allocation19_spill] sm:$0xff] }
 0x21d   : > { %987 = vst [vmem:[#allocation12 + $0xc0] sm:$0xff] %v923_v4  ;;  %v935_v35 = vmax.f32 %v871_v25, 0.0  ;;  %v875_v37 = vadd.f32 %v1854_v15, %v807_v38  ;;  %v811_v54 = vmul.f32 %v1852_v43, %v2139_v24  ;;  %v936_v27 = vmax.f32 %v872_v40, 0.0  ;;  %v2152_v40 = vld [vmem:[#allocation27_spill] sm:$0xff] }
 0x21e   : > { %988 = vst [vmem:[#allocation12 + $0xc8] sm:$0xff] %v924_v8  ;;  %v876_v41 = vadd.f32 %v1854_v15, %v808_v42  ;;  %v812_v58 = vmul.f32 %v1852_v43, %v2140_v11  ;;  %v937_v31 = vmax.f32 %v873_v23, 0.0  ;;  %v877_v45 = vadd.f32 %v1854_v15, %v809_v46  ;;  %v2146_v8 = vld [vmem:[#allocation21_spill] sm:$0xff]  ;;  %v2153_v46 = vld [vmem:[#allocation28_spill] sm:$0xff] }
 0x21f   : > { %989 = vst [vmem:[#allocation12 + $0xd0] sm:$0xff] %v925_v47  ;;  %v813_v51 = vmul.f32 %v1852_v43, %v2141_v63  ;;  %v938_v49 = vmax.f32 %v874_v33, 0.0  ;;  %v878_v48 = vadd.f32 %v1854_v15, %v810_v50  ;;  %v814_v53 = vmul.f32 %v1852_v43, %v2142_v10  ;;  %v2154_v50 = vld [vmem:[#allocation29_spill] sm:$0xff] }
 0x220   : > { %990 = vst [vmem:[#allocation12 + $0xd8] sm:$0xff] %v926_v6  ;;  %v939_v52 = vmax.f32 %v875_v37, 0.0  ;;  %v879_v56 = vadd.f32 %v1854_v15, %v811_v54  ;;  %v815_v14 = vmul.f32 %v1852_v43, %v2143_v57  ;;  %v940_v60 = vmax.f32 %v876_v41, 0.0  ;;  %v2155_v54 = vld [vmem:[#allocation31_spill] sm:$0xff] }
 0x221   : > { %991 = vst [vmem:[#allocation12 + $0xe0] sm:$0xff] %v927_v12  ;;  %v880_v61 = vadd.f32 %v1854_v15, %v812_v58  ;;  %v816_v0 = vmul.f32 %v1852_v43, %v2144_v3  ;;  %v830_v4 = vmul.f32 %v1852_v43, %v2145_v1  ;;  %v941_v7 = vmax.f32 %v877_v45, 0.0  ;;  %v2148_v12 = vld [vmem:[#allocation23_spill] sm:$0xff]  ;;  %v2156_v58 = vld [vmem:[#allocation33_spill] sm:$0xff] }
 0x222   : > { %992 = vst [vmem:[#allocation12 + $0xe8] sm:$0xff] %v928_v28  ;;  %v881_v5 = vadd.f32 %v1854_v15, %v813_v51  ;;  %v817_v16 = vmul.f32 %v1852_v43, %v2146_v8  ;;  %v942_v9 = vmax.f32 %v878_v48, 0.0  ;;  %v882_v47 = vadd.f32 %v1854_v15, %v814_v53  ;;  %v2157_v51 = vld [vmem:[#allocation35_spill] sm:$0xff]  ;;  %v2158_v53 = vld [vmem:[#allocation37_spill] sm:$0xff] }
 0x223   : > { %993 = vst [vmem:[#allocation12 + $0xf0] sm:$0xff] %v929_v32  ;;  %v818_v13 = vmul.f32 %v1852_v43, %v2147_v2  ;;  %v2011_v6 = vadd.f32 %v1854_v15, %v830_v4  ;;  %v943_v19 = vmax.f32 %v879_v56, 0.0  ;;  %v883_v18 = vadd.f32 %v1854_v15, %v815_v14 }
 0x224   : > { %994 = vst [vmem:[#allocation12 + $0xf8] sm:$0xff] %v930_v17  ;;  %v819_v59 = vmul.f32 %v1852_v43, %v2148_v12  ;;  %v944_v22 = vmax.f32 %v880_v61, 0.0  ;;  %v884_v28 = vadd.f32 %v1854_v15, %v816_v0  ;;  %v820_v26 = vmul.f32 %v1852_v43, %v2149_v62 }
 0x225   : > { %995 = vst [vmem:[#allocation12 + $0x100] sm:$0xff] %v931_v21  ;;  %v945_v32 = vmax.f32 %v881_v5, 0.0  ;;  %v885_v20 = vadd.f32 %v1854_v15, %v817_v16  ;;  %v821_v17 = vmul.f32 %v1852_v43, %v2150_v30  ;;  %v946_v36 = vmax.f32 %v882_v47, 0.0  ;;  %v2151_v21 = vld [vmem:[#allocation26_spill] sm:$0xff] }
 0x226   : > { %996 = vst [vmem:[#allocation12 + $0x108] sm:$0xff] %v932_v39  ;;  %v886_v34 = vadd.f32 %v1854_v15, %v818_v13  ;;  %v822_v25 = vmul.f32 %v1852_v43, %v2151_v21  ;;  %v947_v38 = vmax.f32 %v883_v18, 0.0  ;;  %v887_v39 = vadd.f32 %v1854_v15, %v819_v59 }
 0x227   : > { %997 = vst [vmem:[#allocation12 + $0x110] sm:$0xff] %v933_v29  ;;  %v823_v42 = vmul.f32 %v1852_v43, %v2152_v40  ;;  %v948_v29 = vmax.f32 %v884_v28, 0.0  ;;  %v888_v23 = vadd.f32 %v1854_v15, %v820_v26  ;;  %v949_v33 = vmax.f32 %v885_v20, 0.0 }
 0x228   : > { %998 = vst [vmem:[#allocation12 + $0x118] sm:$0xff] %v934_v55  ;;  %v824_v55 = vmul.f32 %v1852_v43, %v2153_v46  ;;  %v889_v44 = vadd.f32 %v1854_v15, %v821_v17  ;;  %v950_v37 = vmax.f32 %v886_v34, 0.0  ;;  %v890_v24 = vadd.f32 %v1854_v15, %v822_v25 }
 0x229   : > { %999 = vst [vmem:[#allocation12 + $0x120] sm:$0xff] %v935_v35  ;;  %v825_v35 = vmul.f32 %v1852_v43, %v2154_v50  ;;  %v951_v41 = vmax.f32 %v887_v39, 0.0  ;;  %v891_v11 = vadd.f32 %v1854_v15, %v823_v42  ;;  %v952_v45 = vmax.f32 %v888_v23, 0.0 }
 0x22a   : > { %1000 = vst [vmem:[#allocation12 + $0x128] sm:$0xff] %v936_v27  ;;  %v826_v27 = vmul.f32 %v1852_v43, %v2155_v54  ;;  %v892_v63 = vadd.f32 %v1854_v15, %v824_v55  ;;  %v953_v48 = vmax.f32 %v889_v44, 0.0  ;;  %v954_v56 = vmax.f32 %v890_v24, 0.0 }
 0x22b   : > { %1001 = vst [vmem:[#allocation12 + $0x130] sm:$0xff] %v937_v31  ;;  %v827_v31 = vmul.f32 %v1852_v43, %v2156_v58  ;;  %v893_v10 = vadd.f32 %v1854_v15, %v825_v35  ;;  %v955_v14 = vmax.f32 %v891_v11, 0.0  ;;  %v962_v8 = vmax.f32 %v2011_v6, 0.0 }
 0x22c   : > { %1002 = vst [vmem:[#allocation12 + $0x138] sm:$0xff] %v938_v49  ;;  %v828_v49 = vmul.f32 %v1852_v43, %v2157_v51  ;;  %v894_v57 = vadd.f32 %v1854_v15, %v826_v27  ;;  %v956_v61 = vmax.f32 %v892_v63, 0.0 }
 0x22d   : > { %1003 = vst [vmem:[#allocation12 + $0x140] sm:$0xff] %v939_v52  ;;  %v829_v52 = vmul.f32 %v1852_v43, %v2158_v53  ;;  %v957_v0 = vmax.f32 %v893_v10, 0.0 }
 0x22e   : > { %1004 = vst [vmem:[#allocation12 + $0x148] sm:$0xff] %v940_v60  ;;  %v895_v60 = vadd.f32 %v1854_v15, %v827_v31  ;;  %v896_v3 = vadd.f32 %v1854_v15, %v828_v49  ;;  %v958_v4 = vmax.f32 %v894_v57, 0.0 }
 0x22f   : > { %1005 = vst [vmem:[#allocation12 + $0x150] sm:$0xff] %v941_v7  ;;  %v897_v1 = vadd.f32 %v1854_v15, %v829_v52 }
 0x230   : > { %1006 = vst [vmem:[#allocation12 + $0x158] sm:$0xff] %v942_v9  ;;  %v959_v43 = vmax.f32 %v895_v60, 0.0  ;;  %v960_v7 = vmax.f32 %v896_v3, 0.0 }
 0x231   : > { %1007 = vst [vmem:[#allocation12 + $0x160] sm:$0xff] %v943_v19  ;;  %v961_v5 = vmax.f32 %v897_v1, 0.0 }
 0x232   : > { %1008 = vst [vmem:[#allocation12 + $0x168] sm:$0xff] %v944_v22 }
 0x233   : > { %1009 = vst [vmem:[#allocation12 + $0x170] sm:$0xff] %v945_v32 }
 0x234   : > { %1010 = vst [vmem:[#allocation12 + $0x178] sm:$0xff] %v946_v36 }
 0x235   : > { %1011 = vst [vmem:[#allocation12 + $0x180] sm:$0xff] %v947_v38 }
 0x236   : > { %1012 = vst [vmem:[#allocation12 + $0x188] sm:$0xff] %v948_v29 }
 0x237   : > { %1013 = vst [vmem:[#allocation12 + $0x190] sm:$0xff] %v949_v33 }
 0x238   : > { %1014 = vst [vmem:[#allocation12 + $0x198] sm:$0xff] %v950_v37 }
 0x239   : > { %1015 = vst [vmem:[#allocation12 + $0x1a0] sm:$0xff] %v951_v41 }
 0x23a   : > { %1016 = vst [vmem:[#allocation12 + $0x1a8] sm:$0xff] %v952_v45 }
 0x23b   : > { %1017 = vst [vmem:[#allocation12 + $0x1b0] sm:$0xff] %v953_v48 }
 0x23c   : > { %1018 = vst [vmem:[#allocation12 + $0x1b8] sm:$0xff] %v954_v56 }
 0x23d   : > { %1019 = vst [vmem:[#allocation12 + $0x1c0] sm:$0xff] %v955_v14 }
 0x23e   : > { %1020 = vst [vmem:[#allocation12 + $0x1c8] sm:$0xff] %v956_v61 }
 0x23f   : > { %1021 = vst [vmem:[#allocation12 + $0x1d0] sm:$0xff] %v957_v0 }
 0x240   : > { %1022 = vst [vmem:[#allocation12 + $0x1d8] sm:$0xff] %v958_v4 }
 0x241   : > { %1023 = vst [vmem:[#allocation12 + $0x1e0] sm:$0xff] %v959_v43 }
 0x242   : > { %1024 = vst [vmem:[#allocation12 + $0x1e8] sm:$0xff] %v960_v7 }
 0x243   : > { %1025 = vst [vmem:[#allocation12 + $0x1f0] sm:$0xff] %v961_v5 }
 0x244   : > { %1026 = vst [vmem:[#allocation12 + $0x1f8] sm:$0xff] %v962_v8 }
 0x245 PF: > { %p1237_p10 = scmp.eq.s32.totalorder %s1135_s15, 1  ;;  %s1043_s17 = sshll.u32 %s2071_s3, 4  ;;  %s1044_s17 = int_to_ptr.hbm [resolvable:$true] %s1043_s17 }
 0x246   : > { %s1437_s18 = smov [#allocation12]   ;;  %s1438_s20 = smov 128  }
 0x247   : > { %s1041_s19 = sshll.u32 %s1437_s18, 4  ;;  %s1439_s21 = smov 8   ;;  %s1042_s19 = int_to_ptr.vmem [resolvable:$true] %s1041_s19 }
 0x248   : > { %1214 = dma.vmem_to_hbm [thread:$0]  (%p1237_p10), %s1042_s19, 8192, %s1044_s17, [#allocation8], %s1438_s20, %s1438_s20, %s1439_s21  }
 0x249 PF: > { %p1238_p11 = scmp.ge.s32.totalorder %s1429_s14, 2  ;;  %p1239_p12 = scmp.eq.s32.totalorder %s1136_s16, 1 }
 0x24b   : > { %p1228_p13 = pnand %p1239_p12, %p1238_p11 }
 0x24d   : > { %p1229_p0 = pneg %p1228_p13 }
 0x24f   : > { %1416 = dma.done.wait (%p1229_p0), [#allocation8], 8192  }
 0x250   : > { %1418 = vsyncadd (%p1229_p0), [#allocation8], 4294959104  ;;  %s18_s14 = sadd.s32 1, %s1429_s14   ;;  %s2159_s12 = smov %s1425_s13 }
 0x251   : > { %p15_p1 = scmp.ge.s32.totalorder %s18_s14, 4   ;;  %s2160_s13 = smov %s2162_s25 }
 0x253   :  { %17 = sbr.rel (!%p15_p1) target bundleno = 5 (0x5), region = 94 }
 0x258   :  { %1065 = vsyncpa [#allocation7], 1 }
 0x259   :  { %1067 = vsyncpa [#allocation7 + $0x1], 1 }
 0x25a   :  { %1068 = vsyncpa [#allocation10], 1 }
 0x25b   :  { %1069 = vsyncpa [#allocation8], 1 }
 0x25c   :  { %1071 = vsyncpa [#allocation8 + $0x1], 1 }

</bundles_post_ra>
